<compile_context>
chip_gen: v5e
topology: v5e:2x2
jax: 0.10.0
libtpu: 0.0.40
codegen_flags: <defaults>
</compile_context>

<pallas_src>
import functools

import jax
import jax.numpy as jnp
from jax.experimental import pallas as pl
from jax.experimental.pallas import tpu as pltpu


def _fc1_partial_kernel(x_ref, w1_ref, part_ref):
    """Accumulate one (B, tk) @ (tk, H) product into the f32 partial block."""
    @pl.when(pl.program_id(1) == 0)
    def _():
        part_ref[...] = jnp.zeros_like(part_ref)

    part_ref[...] += jnp.dot(x_ref[...], w1_ref[...],
                             preferred_element_type=jnp.float32)


def _epilogue_kernel(part_ref, b1_ref, w2_ref, b2_ref, w3_ref, b3_ref, o_ref,
                     *, out_is_scalar):
    # Sum per-split fc1 partials, then bias + ReLU.
    h1 = jnp.sum(part_ref[...], axis=0) + b1_ref[...]            # (B, H)
    h1 = jnp.maximum(h1, 0.0)
    # fc2 + ReLU (small, fully VMEM-resident).
    h2 = jnp.dot(h1, w2_ref[...], preferred_element_type=jnp.float32) + b2_ref[...]
    h2 = jnp.maximum(h2, 0.0)
    if out_is_scalar:
        # fc3 with out_features == 1: VPU multiply + lane reduction instead of
        # a 1-output-lane MXU matmul.
        out = jnp.sum(h2 * w3_ref[...], axis=-1, keepdims=True) + b3_ref[...]
    else:
        out = jnp.dot(h2, w3_ref[...], preferred_element_type=jnp.float32) + b3_ref[...]
    o_ref[...] = out.astype(o_ref.dtype)


def mlp_regressor_forward(x, w1, b1, w2, b2, w3, b3, *,
                          tk=8192, num_splits=2, stream_dtype=jnp.bfloat16):
    """x: (B, D). w1: (D, H), b1: (H,), w2: (H, H2), b2: (H2,), w3: (H2, O), b3: (O,).

    Weights are pre-transposed to (in_features, out_features) so the kernel
    computes y = x @ W + b, identical to PyTorch's x @ W.T + b.
    """
    B, D = x.shape
    H = w1.shape[1]
    H2 = w2.shape[1]
    O = w3.shape[1]
    out_dtype = x.dtype

    # ---- K tiling: large lane-multiple tiles, zero-pad the ragged tail -------
    tk = max(128, min(int(tk), pl.cdiv(D, num_splits)))
    tk = ((tk + 127) // 128) * 128
    kt_per_split = pl.cdiv(D, tk * num_splits)
    Dp = tk * num_splits * kt_per_split

    x_s = x if x.dtype == stream_dtype else x.astype(stream_dtype)
    w1_s = w1 if w1.dtype == stream_dtype else w1.astype(stream_dtype)
    if Dp != D:
        # Exact: padded x columns are zero, so padded W1 rows contribute 0.
        x_s = jnp.pad(x_s, ((0, 0), (0, Dp - D)))
        w1_s = jnp.pad(w1_s, ((0, Dp - D), (0, 0)))

    itemsize = jnp.dtype(stream_dtype).itemsize
    # Double-buffered x/W1 tiles + double-buffered partial block + headroom;
    # keep the scoped limit in [32 MiB, 48 MiB] so it is safe on v5e/v6e
    # (128 MiB VMEM) and v7x (64 MiB physical VMEM).
    vmem_need = 2 * (B * tk + tk * H) * itemsize + 2 * B * H * 4 + (4 << 20)
    vmem_limit = int(min(max(vmem_need, 32 << 20), 48 << 20))

    cost = pl.CostEstimate(
        flops=2 * B * Dp * H,
        transcendentals=0,
        bytes_accessed=(B * Dp + Dp * H) * itemsize + num_splits * B * H * 4,
    )

    # ---- Kernel A: fc1 partial sums, K split across a "parallel" axis --------
    partials = pl.pallas_call(
        _fc1_partial_kernel,
        out_shape=jax.ShapeDtypeStruct((num_splits, B, H), jnp.float32),
        grid_spec=pltpu.PrefetchScalarGridSpec(
            num_scalar_prefetch=0,
            grid=(num_splits, kt_per_split),
            in_specs=[
                pl.BlockSpec((B, tk), lambda s, k: (0, s * kt_per_split + k)),
                pl.BlockSpec((tk, H), lambda s, k: (s * kt_per_split + k, 0)),
            ],
            out_specs=pl.BlockSpec((None, B, H), lambda s, k: (s, 0, 0)),
        ),
        compiler_params=pltpu.CompilerParams(
            dimension_semantics=("parallel", "arbitrary"),
            vmem_limit_bytes=vmem_limit,
        ),
        cost_estimate=cost,
    )(x_s, w1_s)

    # ---- Kernel B: tiny fused epilogue (everything fits in VMEM) -------------
    b1r = b1.reshape(1, H).astype(jnp.float32)
    b2r = b2.reshape(1, H2).astype(jnp.float32)
    b3r = b3.reshape(1, O).astype(jnp.float32)
    w3e = (w3.T if O == 1 else w3).astype(jnp.float32)     # (1, H2) when O == 1

    out = pl.pallas_call(
        functools.partial(_epilogue_kernel, out_is_scalar=(O == 1)),
        out_shape=jax.ShapeDtypeStruct((B, O), out_dtype),
    )(partials, b1r, w2.astype(jnp.float32), b2r, w3e, b3r)
    return out


def _init_linear(key, fan_in, fan_out, dtype=jnp.float32):
    """PyTorch-style init U(-1/sqrt(fan_in), 1/sqrt(fan_in)); weight already (in, out)."""
    kw, kb = jax.random.split(key)
    bound = 1.0 / (fan_in ** 0.5)
    w = jax.random.uniform(kw, (fan_in, fan_out), dtype, minval=-bound, maxval=bound)
    b = jax.random.uniform(kb, (fan_out,), dtype, minval=-bound, maxval=bound)
    return w, b


def _reference_forward(x, w1, b1, w2, b2, w3, b3):
    h1 = jnp.maximum(x @ w1 + b1, 0.0)
    h2 = jnp.maximum(h1 @ w2 + b2, 0.0)
    return h2 @ w3 + b3


if __name__ == "__main__":
    # Small shapes consistent with the module's forward (the original
    # input_dim of 2875392 is shrunk for the demo; hidden_dim kept at 512).
    B = 8
    INPUT_DIM = 2048
    HIDDEN_DIM = 512
    OUTPUT_DIM = 1

    key = jax.random.PRNGKey(0)
    kx, k1, k2, k3 = jax.random.split(key, 4)

    x = jax.random.normal(kx, (B, INPUT_DIM), jnp.float32)
    w1, b1 = _init_linear(k1, INPUT_DIM, HIDDEN_DIM)
    w2, b2 = _init_linear(k2, HIDDEN_DIM, HIDDEN_DIM // 2)
    w3, b3 = _init_linear(k3, HIDDEN_DIM // 2, OUTPUT_DIM)

    out = mlp_regressor_forward(x, w1, b1, w2, b2, w3, b3)
    out = jax.block_until_ready(out)

    # Reference uses the same bf16-rounded x/W1 (the kernel intentionally
    # streams fc1 operands in bf16) with f32 accumulation.
    x_q = x.astype(jnp.bfloat16).astype(jnp.float32)
    w1_q = w1.astype(jnp.bfloat16).astype(jnp.float32)
    ref = _reference_forward(x_q, w1_q, b1, w2, b2, w3, b3)

    assert out.shape == (B, OUTPUT_DIM)
    assert jnp.allclose(out, ref, atol=1e-2, rtol=1e-2), (
        "mismatch vs reference, max abs diff = %s" % jnp.max(jnp.abs(out - ref)))

    print("KERNEL_OK")
</pallas_src>

<mosaic_0001>
module attributes {stable_mosaic.version = 11 : i64} {
  func.func @_fc1_partial_kernel(%arg0: i32, %arg1: i32, %arg2: memref<8x1024xbf16, #tpu.memory_space<vmem>>, %arg3: memref<1024x512xbf16, #tpu.memory_space<vmem>>, %arg4: memref<1x8x512xf32, #tpu.memory_space<vmem>>) attributes {dimension_semantics = [#tpu.dimension_semantics<parallel>, #tpu.dimension_semantics<arbitrary>], iteration_bounds = array<i64: 2, 1>, scalar_prefetch = 0 : i64, scratch_operands = 0 : i64, tpu.core_type = #tpu.core_type<tc>, window_params = [{transform_indices = @transform_0, window_bounds = array<i64: 8, 1024>}, {transform_indices = @transform_1, window_bounds = array<i64: 1024, 512>}, {transform_indices = @transform_2, window_bounds = array<i64: 1, 8, 512>}]} {
    %c0_i32 = arith.constant 0 : i32
    %0 = arith.cmpi eq, %arg1, %c0_i32 : i32
    %1 = arith.extui %0 : i1 to i32
    %c0_i32_0 = arith.constant 0 : i32
    %2 = arith.cmpi ne, %1, %c0_i32_0 : i32
    scf.if %2 {
      %cst_10 = arith.constant 0.000000e+00 : f32
      %12 = vector.broadcast %cst_10 : f32 to vector<8x512xf32>
      %c0_11 = arith.constant 0 : index
      %c0_12 = arith.constant 0 : index
      %c0_13 = arith.constant 0 : index
      %13 = vector.load %arg4[%c0_11, %c0_12, %c0_13] : memref<1x8x512xf32, #tpu.memory_space<vmem>>, vector<1x8x512xf32>
      %14 = vector.shape_cast %13 : vector<1x8x512xf32> to vector<8x512xf32>
      %15 = vector.shape_cast %12 : vector<8x512xf32> to vector<1x8x512xf32>
      tpu.vector_store %arg4[%c0_11, %c0_12, %c0_13], %15 {strides = array<i32>} : memref<1x8x512xf32, #tpu.memory_space<vmem>>, vector<1x8x512xf32>,
    } else {
    }
    %c0 = arith.constant 0 : index
    %c0_1 = arith.constant 0 : index
    %c0_2 = arith.constant 0 : index
    %3 = vector.load %arg4[%c0, %c0_1, %c0_2] : memref<1x8x512xf32, #tpu.memory_space<vmem>>, vector<1x8x512xf32>
    %4 = vector.shape_cast %3 : vector<1x8x512xf32> to vector<8x512xf32>
    %c0_3 = arith.constant 0 : index
    %c0_4 = arith.constant 0 : index
    %5 = vector.load %arg2[%c0_3, %c0_4] : memref<8x1024xbf16, #tpu.memory_space<vmem>>, vector<8x1024xbf16>
    %c0_5 = arith.constant 0 : index
    %c0_6 = arith.constant 0 : index
    %6 = vector.load %arg3[%c0_5, %c0_6] : memref<1024x512xbf16, #tpu.memory_space<vmem>>, vector<1024x512xbf16>
    %cst = arith.constant dense<0.000000e+00> : vector<8x512xf32>
    %7 = tpu.matmul %5, %6, %cst {dimension_numbers = #tpu.dot_dimension_numbers<[1], [0], [0], [1], [0, 0, 1, 1], [], []>} : vector<8x1024xbf16>, vector<1024x512xbf16>, vector<8x512xf32> -> vector<8x512xf32>
    %8 = arith.addf %4, %7 : vector<8x512xf32>
    %c0_7 = arith.constant 0 : index
    %c0_8 = arith.constant 0 : index
    %c0_9 = arith.constant 0 : index
    %9 = vector.load %arg4[%c0_7, %c0_8, %c0_9] : memref<1x8x512xf32, #tpu.memory_space<vmem>>, vector<1x8x512xf32>
    %10 = vector.shape_cast %9 : vector<1x8x512xf32> to vector<8x512xf32>
    %11 = vector.shape_cast %8 : vector<8x512xf32> to vector<1x8x512xf32>
    tpu.vector_store %arg4[%c0_7, %c0_8, %c0_9], %11 {strides = array<i32>} : memref<1x8x512xf32, #tpu.memory_space<vmem>>, vector<1x8x512xf32>,
    return
  }
  func.func @transform_0(%arg0: i32, %arg1: i32) -> (i32, i32) {
    %c1_i32 = arith.constant 1 : i32
    %0 = arith.muli %arg0, %c1_i32 : i32
    %1 = arith.addi %0, %arg1 : i32
    %c0_i32 = arith.constant 0 : i32
    %c0_i32_0 = arith.constant 0 : i32
    return %c0_i32, %1 : i32, i32
  }
  func.func @transform_1(%arg0: i32, %arg1: i32) -> (i32, i32) {
    %c1_i32 = arith.constant 1 : i32
    %0 = arith.muli %arg0, %c1_i32 : i32
    %1 = arith.addi %0, %arg1 : i32
    %c0_i32 = arith.constant 0 : i32
    %c0_i32_0 = arith.constant 0 : i32
    return %1, %c0_i32 : i32, i32
  }
  func.func @transform_2(%arg0: i32, %arg1: i32) -> (i32, i32, i32) {
    %c0_i32 = arith.constant 0 : i32
    %c0_i32_0 = arith.constant 0 : i32
    %c0_i32_1 = arith.constant 0 : i32
    return %arg0, %c0_i32, %c0_i32_0 : i32, i32, i32
  }
}

</mosaic_0001>

<bundles_post_ra>
// kernel: tpu_custom_call.1
= control target key start
LH: loop header
LB: loop body
LE: loop exit
PB: predicated region body
PF: predicated region fallthrough
CT: control target
= control target key end

     0   :  { %7 = vsyncpa [#allocation3], 0  ;;  %s4625_s0 = inlined_call_operand.hbm [shape: bf16[8,2048], index: 0, kind: input, shape index: {}]   ;;  %s4626_s1 = inlined_call_operand.hbm [shape: bf16[2048,512], index: 1, kind: input, shape index: {}]   ;;  %s4627_s2 = inlined_call_operand.hbm [shape: f32[2,8,512], index: 2, kind: output, shape index: {}]  }
   0x1   :  { %9 = vsyncpa [#allocation3 + $0x1], 0 }
   0x2   :  { %10 = vsyncpa [#allocation6], 0 }
   0x3   :  { %12 = vsyncpa [#allocation6 + $0x1], 0 }
   0x4   :  { %13 = vsyncpa [#allocation4], 0 }
   0x5   :  { %15 = vsyncpa [#allocation4 + $0x1], 0  ;;  %s3890_s9 = smov 0   ;;  %s3892_s10 = smov 0  }
   0x6   :  { %s3894_s11 = smov 0   ;;  %s3896_s12 = smov 0  }
   0x7   :  { %s3898_s13 = smov 0   ;;  %s3900_s14 = smov 0  }
   0x8 LB: > { %s2351_s15 = sadd.s32 4294967295, %s3871_s14   ;;  %s2352_s16 = sadd.s32 4294967294, %s3871_s14   ;;  %s3871_s14 = sphi %s3900_s14, %s21_s14   ;;  %s3867_s13 = sphi %s3898_s13, %s4637_s13   ;;  %s3863_s12 = sphi %s3896_s12, %s4636_s12   ;;  %s3859_s11 = sphi %s3894_s11, %s4635_s11   ;;  %s3855_s10 = sphi %s3892_s10, %s4634_s10   ;;  %s3851_s9 = sphi %s3890_s9, %s4633_s9  }
   0x9   : > { %s33_s17 = sadd.s32 1, %s3867_s13  ;;  %s42_s18 = sadd.s32 1, %s3859_s11 }
   0xa   : > { %p35_p0 = scmp.ge.s32.totalorder %s33_s17, 2  ;;  %p49_p1 = scmp.ne.s32.totalorder %s3859_s11, %s3855_s10 }
   0xb   : > { %p50_p2 = scmp.eq.s32.totalorder %s3871_s14, 0  ;;  %p55_p3 = scmp.ne.s32.totalorder %s3855_s10, %s3851_s9 }
   0xc   : > { %s4639_s17 = smov (%p35_p0, %s33_s17), 0  ;;  %p56_p5 = scmp.eq.s32.totalorder %s2351_s15, 0 }
   0xd   : > { %p3931_p4 = por %p50_p2, %p49_p1  ;;  %s39_s20 = ssub.s32 %s3867_s13, %s4639_s17 }
   0xe   : > { %p107_p6 = scmp.eq.s32.totalorder %s2351_s15, 1  ;;  %p40_p7 = scmp.eq.s32.totalorder %s39_s20, 0 }
   0xf   : > { %p3937_p8 = por %p56_p5, %p55_p3  ;;  %p113_p10 = scmp.eq.s32.totalorder %s2352_s16, 1 }
  0x10   : > { %p3941_p9 = por %p107_p6, %p49_p1  ;;  %p2354_p12 = scmp.ge.s32.totalorder %s3871_s14, 2 }
  0x11   : > { %s3946_s23 = scalar_select %p40_p7, %s3859_s11, %s42_s18  }
  0x12   : > { %p3948_p11 = por %p113_p10, %p55_p3  ;;  %p3672_p13 = scmp.lt.s32.totalorder %s3871_s14, 2 }
  0x13   : > { %s3955_s25 = sand.u32 1, %s3859_s11   ;;  %s3395_s27 = sshll.u32 %s3867_s13, 5 }
  0x14   : > { %s2355_s26 = sshll.u32 %s3955_s25, 5  ;;  %s143_s30 = scalar_lea.hbm %s4625_s0, %s3395_s27 }
  0x15   : > { %s137_s3 = scalar_lea.vmem [#allocation2], %s2355_s26  ;;  %s145_s5 = sshll.u32 %s143_s30, 4  ;;  %s146_s5 = int_to_ptr.hbm [resolvable:$true] %s145_s5 }
  0x16   : > { %s147_s4 = sshll.u32 %s137_s3, 4  ;;  %p3964_p0 = pnand %p3672_p13, %p3931_p4  ;;  %s148_s4 = int_to_ptr.vmem [resolvable:$true] %s147_s4 }
  0x17   : > { %p2362_p1 = scmp.ge.s32.totalorder %s3871_s14, 1  ;;  %p176_p2 = scmp.lt.s32.totalorder %s3871_s14, 3 }
  0x18   : > { %s134_s7 = scalar_lea.sflag [#allocation3], %s3955_s25  ;;  %s2358_s8 = sshll.u32 %s3955_s25, 11 }
  0x19   : > { %3664 = dma.hbm_to_vmem [thread:$0]  (!%p3964_p0), %s146_s5, 512, %s148_s4, %s134_s7  }
  0x1a   : > { %p177_p3 = pnand %p2362_p1, %p176_p2  ;;  %s3397_s15 = sshll.u32 %s3867_s13, 11 }
  0x1b   : > { %s165_s20 = scalar_lea.hbm %s4626_s1, %s3397_s15  ;;  %s158_s26 = scalar_lea.vmem [#allocation5], %s2358_s8 }
  0x1c   : > { %s168_s19 = sshll.u32 %s158_s26, 4  ;;  %s166_s27 = sshll.u32 %s165_s20, 4  ;;  %s169_s19 = int_to_ptr.vmem [resolvable:$true] %s168_s19  ;;  %s167_s27 = int_to_ptr.hbm [resolvable:$true] %s166_s27 }
  0x1d   : > { %s155_s28 = scalar_lea.sflag [#allocation6], %s3955_s25  ;;  %s3873_s29 = smov 256  }
  0x1e   : > { %s3874_s30 = smov 16   ;;  %180 = sbr.rel (%p177_p3) target bundleno = 442 (0x1ba), region = 28 }
  0x1f   : > { %3667 = dma.hbm_to_vmem [thread:$0]  (!%p3964_p0), %s167_s27, 32768, %s169_s19, %s155_s28, %s3873_s29, %s3873_s29, %s3874_s30  }
  0x20   : > { %s3982_s3 = sand.u32 (!%p177_p3), 1, %s3855_s10  }
  0x21   : > { %s2363_s4 = sshll.u32 (!%p177_p3), %s3982_s3, 5  ;;  %s183_s5 = scalar_lea.sflag (!%p177_p3), [#allocation3], %s3982_s3 }
  0x22   : > { %s3988_s7 = scalar_lea.vmem (!%p177_p3), [#allocation2], %s2363_s4 }
  0x23   : > { %3838 = dma.done.wait (%p3937_p8), %s183_s5, 512  }
  0x24   : > { %3840 = vsyncadd (%p3937_p8), %s183_s5, 4294966784  ;;  %s2364_s25 = sshll.u32 %s3982_s3, 11  ;;  %s193_s6 = scalar_lea.sflag [#allocation6], %s3982_s3 }
  0x25   : > { %s3996_s8 = scalar_lea.vmem [#allocation5], %s2364_s25 }
  0x26   : > { %3842 = dma.done.wait (%p3937_p8), %s193_s6, 32768  }
  0x27   : > { %3844 = vsyncadd (%p3937_p8), %s193_s6, 4294934528  ;;  %v2480_v0 = vld [vmem:[%s3996_s8 + $0xe0] sm:$0xf]  ;;  %v3428_v1 = vld [vmem:[%s3996_s8 + $0xec] sm:$0xf0]  ;;  %s4494_s21 = scalar_lea.vmem [#allocation7], %s2363_s4 }
  0x28   : > { %v2608_v2 = vld [vmem:[%s3996_s8 + $0x1e0] sm:$0xf]  ;;  %v2481_v3 = vor.u32 %v3428_v1, %v2480_v0  ;;  %v3460_v4 = vld [vmem:[%s3996_s8 + $0x1ec] sm:$0xf0]  ;;  %s3654_s15 = sshll.u32 %s3863_s12, 5  ;;  %s2245_s26 = sshll.u32 %s4494_s21, 4  ;;  %s2246_s26 = int_to_ptr.vmem [resolvable:$true] %s2245_s26 }
  0x29   : > { %v2736_v5 = vld [vmem:[%s3996_s8 + $0x2e0] sm:$0xf]  ;;  %v3492_v6 = vld [vmem:[%s3996_s8 + $0x2ec] sm:$0xf0]  ;;  %v2609_v7 = vor.u32 %v3460_v4, %v2608_v2  ;;  %s2243_s20 = scalar_lea.hbm %s4627_s2, %s3654_s15  ;;  %s2232_s27 = scalar_lea.sflag [#allocation4], %s3982_s3 }
  0x2a   : > { %v2737_v8 = vor.u32 %v3492_v6, %v2736_v5  ;;  %v2864_v9 = vld [vmem:[%s3996_s8 + $0x3e0] sm:$0xf]  ;;  %v3524_v10 = vld [vmem:[%s3996_s8 + $0x3ec] sm:$0xf0]  ;;  %1807 = vmatpush.bf16.msra.mxu0 %v2481_v3  ;;  %s2247_s19 = sshll.u32 %s2243_s20, 4  ;;  %s3805_s4 = scalar_lea.hbm %s4627_s2, 64  ;;  %s2248_s19 = int_to_ptr.hbm [resolvable:$true] %s2247_s19 }
  0x2b   : > { %v2464_v11 = vld [vmem:[%s3996_s8 + $0xc0] sm:$0xf]  ;;  %v2865_v12 = vor.u32 %v3524_v10, %v2864_v9  ;;  %v3424_v13 = vld [vmem:[%s3996_s8 + $0xcc] sm:$0xf0]  ;;  %1820 = vmatpush.bf16.msra.mxu1 %v2609_v7  ;;  %s3799_s12 = sshra.s32 %s2248_s19, 4  ;;  %s3800_s12 = int_to_ptr.hbm [resolvable:$true] %s3799_s12 }
  0x2c   : > { %v2592_v14 = vld [vmem:[%s3996_s8 + $0x1c0] sm:$0xf]  ;;  %v3456_v15 = vld [vmem:[%s3996_s8 + $0x1cc] sm:$0xf0]  ;;  %1833 = vmatpush.bf16.msra.mxu2 %v2737_v8  ;;  %v2465_v16 = vor.u32 %v3424_v13, %v2464_v11  ;;  %s3801_s28 = scalar_lea.hbm %s3800_s12, 32  ;;  %p3806_p7 = scmp.lt.s32.totalorder %s3800_s12, %s4627_s2 }
  0x2d   : > { %v2593_v17 = vor.u32 %v3456_v15, %v2592_v14  ;;  %v2720_v18 = vld [vmem:[%s3996_s8 + $0x2c0] sm:$0xf]  ;;  %v3488_v19 = vld [vmem:[%s3996_s8 + $0x2cc] sm:$0xf0]  ;;  %1846 = vmatpush.bf16.msra.mxu3 %v2865_v12  ;;  %p3802_p4 = scmp.ne.s32.totalorder %s3800_s12, %s3801_s28  ;;  %p3807_p8 = scmp.lt.s32.totalorder %s3805_s4, %s3801_s28 }
  0x2e   : > { %v2848_v20 = vld [vmem:[%s3996_s8 + $0x3c0] sm:$0xf]  ;;  %v2721_v21 = vor.u32 %v3488_v19, %v2720_v18  ;;  %v3520_v22 = vld [vmem:[%s3996_s8 + $0x3cc] sm:$0xf0]  ;;  %1808 = vmatpush.bf16.msra.mxu0 %v2465_v16 }
  0x2f   : > { %v2448_v23 = vld [vmem:[%s3996_s8 + $0xa0] sm:$0xf]  ;;  %v3420_v24 = vld [vmem:[%s3996_s8 + $0xac] sm:$0xf0]  ;;  %v2849_v25 = vor.u32 %v3520_v22, %v2848_v20  ;;  %1821 = vmatpush.bf16.msra.mxu1 %v2593_v17  ;;  %p3803_p5 = pnand %p3802_p4, %p3941_p9  ;;  %p3808_p10 = por %p3807_p8, %p3806_p7 }
  0x30   : > { %v2576_v26 = vld [vmem:[%s3996_s8 + $0x1a0] sm:$0xf]  ;;  %v3452_v27 = vld [vmem:[%s3996_s8 + $0x1ac] sm:$0xf0]  ;;  %v2449_v29 = vor.u32 %v3420_v24, %v2448_v23  ;;  %1834 = vmatpush.bf16.msra.mxu2 %v2721_v21 }
  0x31   : > { %v2704_v28 = vld [vmem:[%s3996_s8 + $0x2a0] sm:$0xf]  ;;  %v3484_v30 = vld [vmem:[%s3996_s8 + $0x2ac] sm:$0xf0]  ;;  %v2577_v33 = vor.u32 %v3452_v27, %v2576_v26  ;;  %1847 = vmatpush.bf16.msra.mxu3 %v2849_v25  ;;  %p3804_p6 = pneg %p3803_p5 }
  0x32   : > { %v2832_v31 = vld [vmem:[%s3996_s8 + $0x3a0] sm:$0xf]  ;;  %v3516_v32 = vld [vmem:[%s3996_s8 + $0x3ac] sm:$0xf0]  ;;  %v2705_v34 = vor.u32 %v3484_v30, %v2704_v28  ;;  %1809 = vmatpush.bf16.msra.mxu0 %v2449_v29 }
  0x33   : > { %v2432_v35 = vld [vmem:[%s3996_s8 + $0x80] sm:$0xf]  ;;  %v3416_v36 = vld [vmem:[%s3996_s8 + $0x8c] sm:$0xf0]  ;;  %v2833_v38 = vor.u32 %v3516_v32, %v2832_v31  ;;  %1822 = vmatpush.bf16.msra.mxu1 %v2577_v33  ;;  %p3809_p13 = pnand %p3808_p10, %p3804_p6 }
  0x34   : > { %v2560_v37 = vld [vmem:[%s3996_s8 + $0x180] sm:$0xf]  ;;  %v3448_v39 = vld [vmem:[%s3996_s8 + $0x18c] sm:$0xf0]  ;;  %v2433_v44 = vor.u32 %v3416_v36, %v2432_v35  ;;  %1835 = vmatpush.bf16.msra.mxu2 %v2705_v34 }
  0x35   : > { %v2688_v40 = vld [vmem:[%s3996_s8 + $0x280] sm:$0xf]  ;;  %v3480_v41 = vld [vmem:[%s3996_s8 + $0x28c] sm:$0xf0]  ;;  %v2561_v45 = vor.u32 %v3448_v39, %v2560_v37  ;;  %1848 = vmatpush.bf16.msra.mxu3 %v2833_v38 }
  0x36   : > { %v2816_v42 = vld [vmem:[%s3996_s8 + $0x380] sm:$0xf]  ;;  %v3512_v43 = vld [vmem:[%s3996_s8 + $0x38c] sm:$0xf0]  ;;  %v2689_v46 = vor.u32 %v3480_v41, %v2688_v40  ;;  %1810 = vmatpush.bf16.msra.mxu0 %v2433_v44 }
  0x37   : > { %v2416_v47 = vld [vmem:[%s3996_s8 + $0x60] sm:$0xf]  ;;  %v3412_v48 = vld [vmem:[%s3996_s8 + $0x6c] sm:$0xf0]  ;;  %v2817_v50 = vor.u32 %v3512_v43, %v2816_v42  ;;  %1823 = vmatpush.bf16.msra.mxu1 %v2561_v45 }
  0x38   : > { %v2544_v49 = vld [vmem:[%s3996_s8 + $0x160] sm:$0xf]  ;;  %v3444_v51 = vld [vmem:[%s3996_s8 + $0x16c] sm:$0xf0]  ;;  %v2417_v56 = vor.u32 %v3412_v48, %v2416_v47  ;;  %1836 = vmatpush.bf16.msra.mxu2 %v2689_v46 }
  0x39   : > { %v2672_v52 = vld [vmem:[%s3996_s8 + $0x260] sm:$0xf]  ;;  %v3476_v53 = vld [vmem:[%s3996_s8 + $0x26c] sm:$0xf0]  ;;  %v2545_v57 = vor.u32 %v3444_v51, %v2544_v49  ;;  %1849 = vmatpush.bf16.msra.mxu3 %v2817_v50 }
  0x3a   : > { %v2800_v54 = vld [vmem:[%s3996_s8 + $0x360] sm:$0xf]  ;;  %v3508_v55 = vld [vmem:[%s3996_s8 + $0x36c] sm:$0xf0]  ;;  %v2673_v58 = vor.u32 %v3476_v53, %v2672_v52  ;;  %1811 = vmatpush.bf16.msra.mxu0 %v2417_v56 }
  0x3b   : > { %v2400_v59 = vld [vmem:[%s3996_s8 + $0x40] sm:$0xf]  ;;  %v3408_v60 = vld [vmem:[%s3996_s8 + $0x4c] sm:$0xf0]  ;;  %v2801_v62 = vor.u32 %v3508_v55, %v2800_v54  ;;  %1824 = vmatpush.bf16.msra.mxu1 %v2545_v57 }
  0x3c   : > { %v2528_v61 = vld [vmem:[%s3996_s8 + $0x140] sm:$0xf]  ;;  %v3440_v63 = vld [vmem:[%s3996_s8 + $0x14c] sm:$0xf0]  ;;  %v2401_v4 = vor.u32 %v3408_v60, %v2400_v59  ;;  %1837 = vmatpush.bf16.msra.mxu2 %v2673_v58  ;;  %v240_v58 = vld [vmem:[%s3988_s7 + $0x8] sm:$0xff] }
  0x3d   : > { %v2656_v0 = vld [vmem:[%s3996_s8 + $0x240] sm:$0xf]  ;;  %v3472_v1 = vld [vmem:[%s3996_s8 + $0x24c] sm:$0xf0]  ;;  %v2529_v5 = vor.u32 %v3440_v63, %v2528_v61  ;;  %1850 = vmatpush.bf16.msra.mxu3 %v2801_v62  ;;  %v505_v63 = vunpack.c.l.b16 %v240_v58 }
  0x3e   : > { %v2784_v2 = vld [vmem:[%s3996_s8 + $0x340] sm:$0xf]  ;;  %v3504_v3 = vld [vmem:[%s3996_s8 + $0x34c] sm:$0xf0]  ;;  %v2657_v6 = vor.u32 %v3472_v1, %v2656_v0  ;;  %1812 = vmatpush.bf16.msra.mxu0 %v2401_v4  ;;  %v506_v0 = vunpack.c.h.b16 %v240_v58 }
  0x3f   : > { %v2384_v7 = vld [vmem:[%s3996_s8 + $0x20] sm:$0xf]  ;;  %v3404_v8 = vld [vmem:[%s3996_s8 + $0x2c] sm:$0xf0]  ;;  %v2785_v10 = vor.u32 %v3504_v3, %v2784_v2  ;;  %1825 = vmatpush.bf16.msra.mxu1 %v2529_v5  ;;  %v4091_v4 = vpack.c.b16 %v505_v63, %v505_v63 }
  0x40   : > { %v2512_v9 = vld [vmem:[%s3996_s8 + $0x120] sm:$0xf]  ;;  %v3436_v11 = vld [vmem:[%s3996_s8 + $0x12c] sm:$0xf0]  ;;  %v2385_v16 = vor.u32 %v3404_v8, %v2384_v7  ;;  %1838 = vmatpush.bf16.msra.mxu2 %v2657_v6  ;;  %v4094_v6 = vpack.c.b16 %v506_v0, %v506_v0 }
  0x41   : > { %v2640_v12 = vld [vmem:[%s3996_s8 + $0x220] sm:$0xf]  ;;  %v3468_v13 = vld [vmem:[%s3996_s8 + $0x22c] sm:$0xf0]  ;;  %v2513_v19 = vor.u32 %v3436_v11, %v2512_v9  ;;  %1851 = vmatpush.bf16.msra.mxu3 %v2785_v10 }
  0x42   : > { %v2768_v14 = vld [vmem:[%s3996_s8 + $0x320] sm:$0xf]  ;;  %v3500_v15 = vld [vmem:[%s3996_s8 + $0x32c] sm:$0xf0]  ;;  %v2641_v20 = vor.u32 %v3468_v13, %v2640_v12  ;;  %1813 = vmatpush.bf16.msra.mxu0 %v2385_v16 }
  0x43   : > { %v2368_v17 = vld [vmem:[%s3996_s8] sm:$0xf]  ;;  %v3400_v18 = vld [vmem:[%s3996_s8 + $0xc] sm:$0xf0]  ;;  %v2769_v24 = vor.u32 %v3500_v15, %v2768_v14  ;;  %1826 = vmatpush.bf16.msra.mxu1 %v2513_v19 }
  0x44   : > { %v2496_v21 = vld [vmem:[%s3996_s8 + $0x100] sm:$0xf]  ;;  %v3432_v22 = vld [vmem:[%s3996_s8 + $0x10c] sm:$0xf0]  ;;  %v2369_v31 = vor.u32 %v3400_v18, %v2368_v17  ;;  %1839 = vmatpush.bf16.msra.mxu2 %v2641_v20 }
  0x45   : > { %v2624_v23 = vld [vmem:[%s3996_s8 + $0x200] sm:$0xf]  ;;  %v3464_v25 = vld [vmem:[%s3996_s8 + $0x20c] sm:$0xf0]  ;;  %v2497_v35 = vor.u32 %v3432_v22, %v2496_v21  ;;  %1852 = vmatpush.bf16.msra.mxu3 %v2769_v24 }
  0x46   : > { %v2752_v26 = vld [vmem:[%s3996_s8 + $0x300] sm:$0xf]  ;;  %v3496_v27 = vld [vmem:[%s3996_s8 + $0x30c] sm:$0xf0]  ;;  %v2625_v36 = vor.u32 %v3464_v25, %v2624_v23  ;;  %1814 = vmatpush.bf16.msra.mxu0 %v2369_v31 }
  0x47   : > { %v2992_v28 = vld [vmem:[%s3996_s8 + $0x4e0] sm:$0xf]  ;;  %v3556_v29 = vld [vmem:[%s3996_s8 + $0x4ec] sm:$0xf0]  ;;  %v2753_v39 = vor.u32 %v3496_v27, %v2752_v26  ;;  %1827 = vmatpush.bf16.msra.mxu1 %v2497_v35 }
  0x48   : > { %v3120_v30 = vld [vmem:[%s3996_s8 + $0x5e0] sm:$0xf]  ;;  %v3588_v32 = vld [vmem:[%s3996_s8 + $0x5ec] sm:$0xf0]  ;;  %v2993_v40 = vor.u32 %v3556_v29, %v2992_v28  ;;  %1840 = vmatpush.bf16.msra.mxu2 %v2625_v36 }
  0x49   : > { %v3248_v33 = vld [vmem:[%s3996_s8 + $0x6e0] sm:$0xf]  ;;  %v3620_v34 = vld [vmem:[%s3996_s8 + $0x6ec] sm:$0xf0]  ;;  %v3121_v41 = vor.u32 %v3588_v32, %v3120_v30  ;;  %1853 = vmatpush.bf16.msra.mxu3 %v2753_v39 }
  0x4a   : > { %v3376_v37 = vld [vmem:[%s3996_s8 + $0x7e0] sm:$0xf]  ;;  %v3652_v38 = vld [vmem:[%s3996_s8 + $0x7ec] sm:$0xf0]  ;;  %v3249_v42 = vor.u32 %v3620_v34, %v3248_v33  ;;  %1859 = vmatpush.bf16.msrb.mxu0 %v2993_v40 }
  0x4b   : > { %v2976_v43 = vld [vmem:[%s3996_s8 + $0x4c0] sm:$0xf]  ;;  %v3552_v44 = vld [vmem:[%s3996_s8 + $0x4cc] sm:$0xf0]  ;;  %v3377_v46 = vor.u32 %v3652_v38, %v3376_v37  ;;  %1872 = vmatpush.bf16.msrb.mxu1 %v3121_v41  ;;  %1841 = vmatmul.bf16.vlgmr.msra.gmra.mxu2 %v4091_v4 }
  0x4c   : > { %v3104_v45 = vld [vmem:[%s3996_s8 + $0x5c0] sm:$0xf]  ;;  %v3584_v47 = vld [vmem:[%s3996_s8 + $0x5cc] sm:$0xf0]  ;;  %v2977_v52 = vor.u32 %v3552_v44, %v2976_v43  ;;  %1885 = vmatpush.bf16.msrb.mxu2 %v3249_v42  ;;  %1854 = vmatmul.bf16.vlgmr.msra.gmra.mxu3 %v4094_v6 }
  0x4d   : > { %v3232_v48 = vld [vmem:[%s3996_s8 + $0x6c0] sm:$0xf]  ;;  %v3616_v49 = vld [vmem:[%s3996_s8 + $0x6cc] sm:$0xf0]  ;;  %v3105_v54 = vor.u32 %v3584_v47, %v3104_v45  ;;  %1898 = vmatpush.bf16.msrb.mxu3 %v3377_v46 }
  0x4e   : > { %v3360_v50 = vld [vmem:[%s3996_s8 + $0x7c0] sm:$0xf]  ;;  %v3648_v51 = vld [vmem:[%s3996_s8 + $0x7cc] sm:$0xf0]  ;;  %v3233_v55 = vor.u32 %v3616_v49, %v3232_v48  ;;  %1860 = vmatpush.bf16.msrb.mxu0 %v2977_v52 }
  0x4f   : > { %v2960_v53 = vld [vmem:[%s3996_s8 + $0x4a0] sm:$0xf]  ;;  %v3548_v56 = vld [vmem:[%s3996_s8 + $0x4ac] sm:$0xf0]  ;;  %v3361_v59 = vor.u32 %v3648_v51, %v3360_v50  ;;  %1873 = vmatpush.bf16.msrb.mxu1 %v3105_v54 }
  0x50   : > { %v3088_v57 = vld [vmem:[%s3996_s8 + $0x5a0] sm:$0xf]  ;;  %v3580_v60 = vld [vmem:[%s3996_s8 + $0x5ac] sm:$0xf0]  ;;  %v2961_v3 = vor.u32 %v3548_v56, %v2960_v53  ;;  %1886 = vmatpush.bf16.msrb.mxu2 %v3233_v55 }
  0x51   : > { %v3216_v61 = vld [vmem:[%s3996_s8 + $0x6a0] sm:$0xf]  ;;  %v3612_v62 = vld [vmem:[%s3996_s8 + $0x6ac] sm:$0xf0]  ;;  %v3089_v7 = vor.u32 %v3580_v60, %v3088_v57  ;;  %1899 = vmatpush.bf16.msrb.mxu3 %v3361_v59 }
  0x52   : > { %v3344_v1 = vld [vmem:[%s3996_s8 + $0x7a0] sm:$0xf]  ;;  %v3644_v2 = vld [vmem:[%s3996_s8 + $0x7ac] sm:$0xf0]  ;;  %v3217_v8 = vor.u32 %v3612_v62, %v3216_v61  ;;  %1861 = vmatpush.bf16.msrb.mxu0 %v2961_v3  ;;  %v242_v3 = vld [vmem:[%s3988_s7 + $0x18] sm:$0xff] }
  0x53   : > { %v239_v5 = vld [vmem:[%s3988_s7] sm:$0xff]  ;;  %v3544_v10 = vld [vmem:[%s3996_s8 + $0x48c] sm:$0xf0]  ;;  %v3345_v14 = vor.u32 %v3644_v2, %v3344_v1  ;;  %1874 = vmatpush.bf16.msrb.mxu1 %v3089_v7 }
  0x54   : > { %v2944_v9 = vld [vmem:[%s3996_s8 + $0x480] sm:$0xf]  ;;  %v503_v12 = vunpack.c.l.b16 %v239_v5  ;;  %v504_v13 = vunpack.c.h.b16 %v239_v5  ;;  %v3576_v15 = vld [vmem:[%s3996_s8 + $0x58c] sm:$0xf0]  ;;  %1887 = vmatpush.bf16.msrb.mxu2 %v3217_v8 }
  0x55   : > { %v3072_v11 = vld [vmem:[%s3996_s8 + $0x580] sm:$0xf]  ;;  %v3608_v17 = vld [vmem:[%s3996_s8 + $0x68c] sm:$0xf0]  ;;  %v2945_v22 = vor.u32 %v3544_v10, %v2944_v9  ;;  %1900 = vmatpush.bf16.msrb.mxu3 %v3345_v14  ;;  %v3426_v10 = vld [vmem:[%s3996_s8 + $0xe4] sm:$0xf] }
  0x56   : > { %v3200_v16 = vld [vmem:[%s3996_s8 + $0x680] sm:$0xf]  ;;  %v3640_v19 = vld [vmem:[%s3996_s8 + $0x78c] sm:$0xf0]  ;;  %v4105_v20 = vpack.c.b16 %v503_v12, %v503_v12  ;;  %v4108_v21 = vpack.c.b16 %v504_v13, %v504_v13  ;;  %v3073_v23 = vor.u32 %v3576_v15, %v3072_v11  ;;  %v2482_v11 = vld [vmem:[%s3996_s8 + $0xf0] sm:$0xf0] }
  0x57   : > { %v3328_v18 = vld [vmem:[%s3996_s8 + $0x780] sm:$0xf]  ;;  %v3201_v24 = vor.u32 %v3608_v17, %v3200_v16  ;;  %v3540_v26 = vld [vmem:[%s3996_s8 + $0x46c] sm:$0xf0]  ;;  %1862 = vmatpush.bf16.msrb.mxu0 %v2945_v22  ;;  %v3458_v12 = vld [vmem:[%s3996_s8 + $0x1e4] sm:$0xf]  ;;  %v509_v17 = vunpack.c.l.b16 %v242_v3 }
  0x58   : > { %v2928_v25 = vld [vmem:[%s3996_s8 + $0x460] sm:$0xf]  ;;  %v3329_v28 = vor.u32 %v3640_v19, %v3328_v18  ;;  %v3572_v29 = vld [vmem:[%s3996_s8 + $0x56c] sm:$0xf0]  ;;  %1815 = vmatmul.bf16.vlgmr.msra.gmra.mxu0 %v4105_v20  ;;  %1828 = vmatmul.bf16.vlgmr.msra.gmra.mxu1 %v4108_v21  ;;  %v2610_v14 = vld [vmem:[%s3996_s8 + $0x1f0] sm:$0xf0] }
  0x59   : > { %v3056_v27 = vld [vmem:[%s3996_s8 + $0x560] sm:$0xf]  ;;  %v3604_v31 = vld [vmem:[%s3996_s8 + $0x66c] sm:$0xf0]  ;;  %v2929_v34 = vor.u32 %v3540_v26, %v2928_v25  ;;  %1875 = vmatpush.bf16.msrb.mxu1 %v3073_v23  ;;  %1888 = vmatpush.bf16.msrb.mxu2 %v3201_v24  ;;  %v3490_v15 = vld [vmem:[%s3996_s8 + $0x2e4] sm:$0xf]  ;;  %v510_v25 = vunpack.c.h.b16 %v242_v3 }
  0x5a   : > { %v3184_v30 = vld [vmem:[%s3996_s8 + $0x660] sm:$0xf]  ;;  %v3636_v33 = vld [vmem:[%s3996_s8 + $0x76c] sm:$0xf0]  ;;  %v3057_v35 = vor.u32 %v3572_v29, %v3056_v27  ;;  %1901 = vmatpush.bf16.msrb.mxu3 %v3329_v28  ;;  %v2738_v16 = vld [vmem:[%s3996_s8 + $0x2f0] sm:$0xf0]  ;;  %v2485_v27 = vor.u32 %v3426_v10, %v2482_v11  ;;  %v2613_v29 = vor.u32 %v3458_v12, %v2610_v14 }
  0x5b   : > { %v3312_v32 = vld [vmem:[%s3996_s8 + $0x760] sm:$0xf]  ;;  %v3185_v36 = vor.u32 %v3604_v31, %v3184_v30  ;;  %v3536_v38 = vld [vmem:[%s3996_s8 + $0x44c] sm:$0xf0]  ;;  %1863 = vmatpush.bf16.msrb.mxu0 %v2929_v34  ;;  %v3522_v22 = vld [vmem:[%s3996_s8 + $0x3e4] sm:$0xf]  ;;  %v2741_v30 = vor.u32 %v3490_v15, %v2738_v16 }
  0x5c   : > { %v2912_v37 = vld [vmem:[%s3996_s8 + $0x440] sm:$0xf]  ;;  %v3313_v40 = vor.u32 %v3636_v33, %v3312_v32  ;;  %v3568_v41 = vld [vmem:[%s3996_s8 + $0x54c] sm:$0xf0]  ;;  %v2866_v23 = vld [vmem:[%s3996_s8 + $0x3f0] sm:$0xf0] }
  0x5d   : > { %v3040_v39 = vld [vmem:[%s3996_s8 + $0x540] sm:$0xf]  ;;  %v3600_v43 = vld [vmem:[%s3996_s8 + $0x64c] sm:$0xf0]  ;;  %v2913_v46 = vor.u32 %v3536_v38, %v2912_v37  ;;  %1876 = vmatpush.bf16.msrb.mxu1 %v3057_v35  ;;  %1889 = vmatpush.bf16.msrb.mxu2 %v3185_v36  ;;  %v3422_v31 = vld [vmem:[%s3996_s8 + $0xc4] sm:$0xf]  ;;  %v2869_v34 = vor.u32 %v3522_v22, %v2866_v23  ;;  %v4160_v38 = vpack.c.b16 %v509_v17, %v509_v17 }
  0x5e   : > { %v3168_v42 = vld [vmem:[%s3996_s8 + $0x640] sm:$0xf]  ;;  %v3632_v45 = vld [vmem:[%s3996_s8 + $0x74c] sm:$0xf0]  ;;  %v3041_v47 = vor.u32 %v3568_v41, %v3040_v39  ;;  %1902 = vmatpush.bf16.msrb.mxu3 %v3313_v40  ;;  %v2466_v32 = vld [vmem:[%s3996_s8 + $0xd0] sm:$0xf0] }
  0x5f   : > { %v3296_v44 = vld [vmem:[%s3996_s8 + $0x740] sm:$0xf]  ;;  %v3169_v48 = vor.u32 %v3600_v43, %v3168_v42  ;;  %v3532_v50 = vld [vmem:[%s3996_s8 + $0x42c] sm:$0xf0]  ;;  %1864 = vmatpush.bf16.msrb.mxu0 %v2913_v46  ;;  %v3454_v33 = vld [vmem:[%s3996_s8 + $0x1c4] sm:$0xf]  ;;  %v4166_v42 = vpack.c.b16 %v510_v25, %v510_v25  ;;  %v2469_v43 = vor.u32 %v3422_v31, %v2466_v32 }
  0x60   : > { %v2896_v49 = vld [vmem:[%s3996_s8 + $0x420] sm:$0xf]  ;;  %v3297_v52 = vor.u32 %v3632_v45, %v3296_v44  ;;  %v3564_v53 = vld [vmem:[%s3996_s8 + $0x52c] sm:$0xf0]  ;;  %v2594_v35 = vld [vmem:[%s3996_s8 + $0x1d0] sm:$0xf0] }
  0x61   : > { %v3024_v51 = vld [vmem:[%s3996_s8 + $0x520] sm:$0xf]  ;;  %v3596_v55 = vld [vmem:[%s3996_s8 + $0x62c] sm:$0xf0]  ;;  %v2897_v59 = vor.u32 %v3532_v50, %v2896_v49  ;;  %1877 = vmatpush.bf16.msrb.mxu1 %v3041_v47  ;;  %1890 = vmatpush.bf16.msrb.mxu2 %v3169_v48  ;;  %v3486_v36 = vld [vmem:[%s3996_s8 + $0x2c4] sm:$0xf]  ;;  %v2597_v45 = vor.u32 %v3454_v33, %v2594_v35 }
  0x62   : > { %v3152_v54 = vld [vmem:[%s3996_s8 + $0x620] sm:$0xf]  ;;  %v3628_v57 = vld [vmem:[%s3996_s8 + $0x72c] sm:$0xf0]  ;;  %v3025_v63 = vor.u32 %v3564_v53, %v3024_v51  ;;  %1903 = vmatpush.bf16.msrb.mxu3 %v3297_v52  ;;  %v2722_v37 = vld [vmem:[%s3996_s8 + $0x2d0] sm:$0xf0] }
  0x63   : > { %v3280_v56 = vld [vmem:[%s3996_s8 + $0x720] sm:$0xf]  ;;  %v3528_v60 = vld [vmem:[%s3996_s8 + $0x40c] sm:$0xf0]  ;;  %v3153_v0 = vor.u32 %v3596_v55, %v3152_v54  ;;  %1865 = vmatpush.bf16.msrb.mxu0 %v2897_v59  ;;  %v3518_v39 = vld [vmem:[%s3996_s8 + $0x3c4] sm:$0xf]  ;;  %v2725_v46 = vor.u32 %v3486_v36, %v2722_v37 }
  0x64   : > { %v2880_v58 = vld [vmem:[%s3996_s8 + $0x400] sm:$0xf]  ;;  %v3560_v62 = vld [vmem:[%s3996_s8 + $0x50c] sm:$0xf0]  ;;  %v3281_v5 = vor.u32 %v3628_v57, %v3280_v56  ;;  %v2850_v40 = vld [vmem:[%s3996_s8 + $0x3d0] sm:$0xf0] }
  0x65   : > { %v3008_v61 = vld [vmem:[%s3996_s8 + $0x500] sm:$0xf]  ;;  %v3592_v2 = vld [vmem:[%s3996_s8 + $0x60c] sm:$0xf0]  ;;  %v2881_v13 = vor.u32 %v3528_v60, %v2880_v58  ;;  %1878 = vmatpush.bf16.msrb.mxu1 %v3025_v63  ;;  %1891 = vmatpush.bf16.msrb.mxu2 %v3153_v0  ;;  %v3418_v47 = vld [vmem:[%s3996_s8 + $0xa4] sm:$0xf]  ;;  %v2853_v50 = vor.u32 %v3518_v39, %v2850_v40 }
  0x66   : > { %v3136_v1 = vld [vmem:[%s3996_s8 + $0x600] sm:$0xf]  ;;  %v3624_v8 = vld [vmem:[%s3996_s8 + $0x70c] sm:$0xf0]  ;;  %v3009_v18 = vor.u32 %v3560_v62, %v3008_v61  ;;  %1904 = vmatpush.bf16.msrb.mxu3 %v3281_v5  ;;  %v2450_v48 = vld [vmem:[%s3996_s8 + $0xb0] sm:$0xf0] }
  0x67   : > { %v3264_v7 = vld [vmem:[%s3996_s8 + $0x700] sm:$0xf]  ;;  %v241_v9 = vld [vmem:[%s3988_s7 + $0x10] sm:$0xff]  ;;  %v3137_v19 = vor.u32 %v3592_v2, %v3136_v1  ;;  %1866 = vmatpush.bf16.msrb.mxu0 %v2881_v13  ;;  %v3450_v49 = vld [vmem:[%s3996_s8 + $0x1a4] sm:$0xf]  ;;  %v2453_v56 = vor.u32 %v3418_v47, %v2450_v48 }
  0x68   : > { %v507_v24 = vunpack.c.l.b16 %v241_v9  ;;  %v3265_v26 = vor.u32 %v3624_v8, %v3264_v7  ;;  %v508_v28 = vunpack.c.h.b16 %v241_v9  ;;  %v2578_v51 = vld [vmem:[%s3996_s8 + $0x1b0] sm:$0xf0]  ;;  %v3482_v52 = vld [vmem:[%s3996_s8 + $0x2a4] sm:$0xf] }
  0x69   : > { %1879 = vmatpush.bf16.msrb.mxu1 %v3009_v18  ;;  %1892 = vmatpush.bf16.msrb.mxu2 %v3137_v19  ;;  %v2706_v53 = vld [vmem:[%s3996_s8 + $0x2b0] sm:$0xf0]  ;;  %v3514_v54 = vld [vmem:[%s3996_s8 + $0x3a4] sm:$0xf]  ;;  %v2581_v57 = vor.u32 %v3450_v49, %v2578_v51 }
  0x6a   : > { %v4164_v41 = vpack.c.b16 %v507_v24, %v507_v24  ;;  %1905 = vmatpush.bf16.msrb.mxu3 %v3265_v26  ;;  %v4168_v44 = vpack.c.b16 %v508_v28, %v508_v28  ;;  %v2834_v55 = vld [vmem:[%s3996_s8 + $0x3b0] sm:$0xf0]  ;;  %v2709_v58 = vor.u32 %v3482_v52, %v2706_v53  ;;  %v3414_v59 = vld [vmem:[%s3996_s8 + $0x84] sm:$0xf] }
  0x6b   : > { %1911 = vmatpush.bf16.msra.mxu0 %v2485_v27  ;;  %v2434_v60 = vld [vmem:[%s3996_s8 + $0x90] sm:$0xf0]  ;;  %v3446_v61 = vld [vmem:[%s3996_s8 + $0x184] sm:$0xf]  ;;  %v2837_v62 = vor.u32 %v3514_v54, %v2834_v55 }
  0x6c   : > { %1893 = vmatmul.bf16.vlgmr.msrb.gmra.mxu2 %v4160_v38  ;;  %1867 = vmatmul.bf16.vlgmr.msrb.gmra.mxu0 %v4164_v41  ;;  %v2562_v63 = vld [vmem:[%s3996_s8 + $0x190] sm:$0xf0]  ;;  %v3478_v0 = vld [vmem:[%s3996_s8 + $0x284] sm:$0xf]  ;;  %v2437_v5 = vor.u32 %v3414_v59, %v2434_v60 }
  0x6d   : > { %1924 = vmatpush.bf16.msra.mxu1 %v2613_v29  ;;  %1937 = vmatpush.bf16.msra.mxu2 %v2741_v30  ;;  %v2690_v1 = vld [vmem:[%s3996_s8 + $0x290] sm:$0xf0]  ;;  %v3510_v2 = vld [vmem:[%s3996_s8 + $0x384] sm:$0xf]  ;;  %v2565_v7 = vor.u32 %v3446_v61, %v2562_v63 }
  0x6e   : > { %1950 = vmatpush.bf16.msra.mxu3 %v2869_v34  ;;  %1880 = vmatmul.bf16.vlgmr.msrb.gmra.mxu1 %v4168_v44  ;;  %v2818_v3 = vld [vmem:[%s3996_s8 + $0x390] sm:$0xf0]  ;;  %v2693_v8 = vor.u32 %v3478_v0, %v2690_v1  ;;  %v3410_v9 = vld [vmem:[%s3996_s8 + $0x64] sm:$0xf] }
  0x6f   : > { %1906 = vmatmul.bf16.vlgmr.msrb.gmra.mxu3 %v4166_v42  ;;  %1912 = vmatpush.bf16.msra.mxu0 %v2469_v43  ;;  %v2418_v10 = vld [vmem:[%s3996_s8 + $0x70] sm:$0xf0]  ;;  %v3442_v11 = vld [vmem:[%s3996_s8 + $0x164] sm:$0xf]  ;;  %v2821_v12 = vor.u32 %v3510_v2, %v2818_v3 }
  0x70   : > { %v2546_v13 = vld [vmem:[%s3996_s8 + $0x170] sm:$0xf0]  ;;  %v3474_v14 = vld [vmem:[%s3996_s8 + $0x264] sm:$0xf]  ;;  %v2421_v18 = vor.u32 %v3410_v9, %v2418_v10 }
  0x71   : > { %1925 = vmatpush.bf16.msra.mxu1 %v2597_v45  ;;  %1938 = vmatpush.bf16.msra.mxu2 %v2725_v46  ;;  %v2674_v15 = vld [vmem:[%s3996_s8 + $0x270] sm:$0xf0]  ;;  %v3506_v16 = vld [vmem:[%s3996_s8 + $0x364] sm:$0xf]  ;;  %v2549_v19 = vor.u32 %v3442_v11, %v2546_v13 }
  0x72   : > { %1951 = vmatpush.bf16.msra.mxu3 %v2853_v50  ;;  %v2802_v17 = vld [vmem:[%s3996_s8 + $0x370] sm:$0xf0]  ;;  %v2677_v22 = vor.u32 %v3474_v14, %v2674_v15  ;;  %v3406_v23 = vld [vmem:[%s3996_s8 + $0x44] sm:$0xf] }
  0x73   : > { %1913 = vmatpush.bf16.msra.mxu0 %v2453_v56  ;;  %v2402_v24 = vld [vmem:[%s3996_s8 + $0x50] sm:$0xf0]  ;;  %v3438_v25 = vld [vmem:[%s3996_s8 + $0x144] sm:$0xf]  ;;  %v2805_v26 = vor.u32 %v3506_v16, %v2802_v17 }
  0x74   : > { %v2530_v27 = vld [vmem:[%s3996_s8 + $0x150] sm:$0xf0]  ;;  %v3470_v28 = vld [vmem:[%s3996_s8 + $0x244] sm:$0xf]  ;;  %v2405_v32 = vor.u32 %v3406_v23, %v2402_v24 }
  0x75   : > { %1926 = vmatpush.bf16.msra.mxu1 %v2581_v57  ;;  %1939 = vmatpush.bf16.msra.mxu2 %v2709_v58  ;;  %v2658_v29 = vld [vmem:[%s3996_s8 + $0x250] sm:$0xf0]  ;;  %v3502_v30 = vld [vmem:[%s3996_s8 + $0x344] sm:$0xf]  ;;  %v2533_v33 = vor.u32 %v3438_v25, %v2530_v27 }
  0x76   : > { %1952 = vmatpush.bf16.msra.mxu3 %v2837_v62  ;;  %v2786_v31 = vld [vmem:[%s3996_s8 + $0x350] sm:$0xf0]  ;;  %v2661_v34 = vor.u32 %v3470_v28, %v2658_v29  ;;  %v3402_v35 = vld [vmem:[%s3996_s8 + $0x24] sm:$0xf] }
  0x77   : > { %1914 = vmatpush.bf16.msra.mxu0 %v2437_v5  ;;  %v2386_v36 = vld [vmem:[%s3996_s8 + $0x30] sm:$0xf0]  ;;  %v3434_v37 = vld [vmem:[%s3996_s8 + $0x124] sm:$0xf]  ;;  %v2789_v39 = vor.u32 %v3502_v30, %v2786_v31 }
  0x78   : > { %v2514_v40 = vld [vmem:[%s3996_s8 + $0x130] sm:$0xf0]  ;;  %v3466_v43 = vld [vmem:[%s3996_s8 + $0x224] sm:$0xf]  ;;  %v2389_v48 = vor.u32 %v3402_v35, %v2386_v36 }
  0x79   : > { %1927 = vmatpush.bf16.msra.mxu1 %v2565_v7  ;;  %1940 = vmatpush.bf16.msra.mxu2 %v2693_v8  ;;  %v2642_v45 = vld [vmem:[%s3996_s8 + $0x230] sm:$0xf0]  ;;  %v3498_v46 = vld [vmem:[%s3996_s8 + $0x324] sm:$0xf]  ;;  %v2517_v51 = vor.u32 %v3434_v37, %v2514_v40 }
  0x7a   : > { %1953 = vmatpush.bf16.msra.mxu3 %v2821_v12  ;;  %v2770_v47 = vld [vmem:[%s3996_s8 + $0x330] sm:$0xf0]  ;;  %v3398_v49 = vld [vmem:[%s3996_s8 + $0x4] sm:$0xf]  ;;  %v2645_v52 = vor.u32 %v3466_v43, %v2642_v45 }
  0x7b   : > { %1915 = vmatpush.bf16.msra.mxu0 %v2421_v18  ;;  %v2370_v50 = vld [vmem:[%s3996_s8 + $0x10] sm:$0xf0]  ;;  %v3430_v53 = vld [vmem:[%s3996_s8 + $0x104] sm:$0xf]  ;;  %v2773_v56 = vor.u32 %v3498_v46, %v2770_v47 }
  0x7c   : > { %v2498_v54 = vld [vmem:[%s3996_s8 + $0x110] sm:$0xf0]  ;;  %v3462_v55 = vld [vmem:[%s3996_s8 + $0x204] sm:$0xf]  ;;  %v2373_v63 = vor.u32 %v3398_v49, %v2370_v50 }
  0x7d   : > { %1928 = vmatpush.bf16.msra.mxu1 %v2549_v19  ;;  %1941 = vmatpush.bf16.msra.mxu2 %v2677_v22  ;;  %v2626_v57 = vld [vmem:[%s3996_s8 + $0x210] sm:$0xf0]  ;;  %v3494_v58 = vld [vmem:[%s3996_s8 + $0x304] sm:$0xf]  ;;  %v2501_v3 = vor.u32 %v3430_v53, %v2498_v54 }
  0x7e   : > { %1954 = vmatpush.bf16.msra.mxu3 %v2805_v26  ;;  %v2754_v59 = vld [vmem:[%s3996_s8 + $0x310] sm:$0xf0]  ;;  %v3554_v60 = vld [vmem:[%s3996_s8 + $0x4e4] sm:$0xf]  ;;  %v2629_v5 = vor.u32 %v3462_v55, %v2626_v57 }
  0x7f   : > { %1916 = vmatpush.bf16.msra.mxu0 %v2405_v32  ;;  %v2994_v61 = vld [vmem:[%s3996_s8 + $0x4f0] sm:$0xf0]  ;;  %v3586_v62 = vld [vmem:[%s3996_s8 + $0x5e4] sm:$0xf]  ;;  %v2757_v9 = vor.u32 %v3494_v58, %v2754_v59 }
  0x80   : > { %v3122_v0 = vld [vmem:[%s3996_s8 + $0x5f0] sm:$0xf0]  ;;  %v3618_v1 = vld [vmem:[%s3996_s8 + $0x6e4] sm:$0xf]  ;;  %v2997_v10 = vor.u32 %v3554_v60, %v2994_v61 }
  0x81   : > { %1929 = vmatpush.bf16.msra.mxu1 %v2533_v33  ;;  %1942 = vmatpush.bf16.msra.mxu2 %v2661_v34  ;;  %v3250_v2 = vld [vmem:[%s3996_s8 + $0x6f0] sm:$0xf0]  ;;  %v3650_v7 = vld [vmem:[%s3996_s8 + $0x7e4] sm:$0xf]  ;;  %v3125_v11 = vor.u32 %v3586_v62, %v3122_v0 }
  0x82   : > { %1955 = vmatpush.bf16.msra.mxu3 %v2789_v39  ;;  %v3378_v8 = vld [vmem:[%s3996_s8 + $0x7f0] sm:$0xf0]  ;;  %v3253_v12 = vor.u32 %v3618_v1, %v3250_v2  ;;  %v3550_v13 = vld [vmem:[%s3996_s8 + $0x4c4] sm:$0xf] }
  0x83   : > { %1917 = vmatpush.bf16.msra.mxu0 %v2389_v48  ;;  %v2978_v14 = vld [vmem:[%s3996_s8 + $0x4d0] sm:$0xf0]  ;;  %v3582_v15 = vld [vmem:[%s3996_s8 + $0x5c4] sm:$0xf]  ;;  %v3381_v16 = vor.u32 %v3650_v7, %v3378_v8 }
  0x84   : > { %v3106_v17 = vld [vmem:[%s3996_s8 + $0x5d0] sm:$0xf0]  ;;  %v3614_v18 = vld [vmem:[%s3996_s8 + $0x6c4] sm:$0xf]  ;;  %v2981_v24 = vor.u32 %v3550_v13, %v2978_v14 }
  0x85   : > { %1930 = vmatpush.bf16.msra.mxu1 %v2517_v51  ;;  %1943 = vmatpush.bf16.msra.mxu2 %v2645_v52  ;;  %v3234_v19 = vld [vmem:[%s3996_s8 + $0x6d0] sm:$0xf0]  ;;  %v3646_v22 = vld [vmem:[%s3996_s8 + $0x7c4] sm:$0xf]  ;;  %v3109_v25 = vor.u32 %v3582_v15, %v3106_v17 }
  0x86   : > { %1956 = vmatpush.bf16.msra.mxu3 %v2773_v56  ;;  %v3362_v23 = vld [vmem:[%s3996_s8 + $0x7d0] sm:$0xf0]  ;;  %v3237_v26 = vor.u32 %v3614_v18, %v3234_v19  ;;  %v3546_v27 = vld [vmem:[%s3996_s8 + $0x4a4] sm:$0xf] }
  0x87   : > { %1918 = vmatpush.bf16.msra.mxu0 %v2373_v63  ;;  %v2962_v28 = vld [vmem:[%s3996_s8 + $0x4b0] sm:$0xf0]  ;;  %v3578_v29 = vld [vmem:[%s3996_s8 + $0x5a4] sm:$0xf]  ;;  %v3365_v30 = vor.u32 %v3646_v22, %v3362_v23 }
  0x88   : > { %v3090_v31 = vld [vmem:[%s3996_s8 + $0x5b0] sm:$0xf0]  ;;  %v3610_v32 = vld [vmem:[%s3996_s8 + $0x6a4] sm:$0xf]  ;;  %v2965_v36 = vor.u32 %v3546_v27, %v2962_v28 }
  0x89   : > { %1931 = vmatpush.bf16.msra.mxu1 %v2501_v3  ;;  %1944 = vmatpush.bf16.msra.mxu2 %v2629_v5  ;;  %v3218_v33 = vld [vmem:[%s3996_s8 + $0x6b0] sm:$0xf0]  ;;  %v3642_v34 = vld [vmem:[%s3996_s8 + $0x7a4] sm:$0xf]  ;;  %v3093_v37 = vor.u32 %v3578_v29, %v3090_v31 }
  0x8a   : > { %1957 = vmatpush.bf16.msra.mxu3 %v2757_v9  ;;  %v3346_v35 = vld [vmem:[%s3996_s8 + $0x7b0] sm:$0xf0]  ;;  %1919 = vmatmul.bf16.vlgmr.msra.gmra.mxu0 %v4105_v20  ;;  %v3221_v39 = vor.u32 %v3610_v32, %v3218_v33  ;;  %v3542_v40 = vld [vmem:[%s3996_s8 + $0x484] sm:$0xf] }
  0x8b   : > { %1963 = vmatpush.bf16.msrb.mxu0 %v2997_v10  ;;  %v2946_v43 = vld [vmem:[%s3996_s8 + $0x490] sm:$0xf0]  ;;  %v3574_v45 = vld [vmem:[%s3996_s8 + $0x584] sm:$0xf]  ;;  %v3349_v46 = vor.u32 %v3642_v34, %v3346_v35 }
  0x8c   : > { %1945 = vmatmul.bf16.vlgmr.msra.gmra.mxu2 %v4091_v4  ;;  %1932 = vmatmul.bf16.vlgmr.msra.gmra.mxu1 %v4108_v21  ;;  %v3074_v47 = vld [vmem:[%s3996_s8 + $0x590] sm:$0xf0]  ;;  %v3606_v48 = vld [vmem:[%s3996_s8 + $0x684] sm:$0xf]  ;;  %v2949_v52 = vor.u32 %v3542_v40, %v2946_v43  ;;  %v2488_v43 = vld [vmem:[%s3996_s8 + $0xe8] sm:$0xf] }
  0x8d   : > { %1976 = vmatpush.bf16.msrb.mxu1 %v3125_v11  ;;  %1989 = vmatpush.bf16.msrb.mxu2 %v3253_v12  ;;  %v3202_v49 = vld [vmem:[%s3996_s8 + $0x690] sm:$0xf0]  ;;  %v3638_v50 = vld [vmem:[%s3996_s8 + $0x784] sm:$0xf]  ;;  %v3077_v53 = vor.u32 %v3574_v45, %v3074_v47  ;;  %v3429_v45 = vld [vmem:[%s3996_s8 + $0xf4] sm:$0xf0] }
  0x8e   : > { %2002 = vmatpush.bf16.msrb.mxu3 %v3381_v16  ;;  %v3330_v51 = vld [vmem:[%s3996_s8 + $0x790] sm:$0xf0]  ;;  %v3205_v54 = vor.u32 %v3606_v48, %v3202_v49  ;;  %v3538_v55 = vld [vmem:[%s3996_s8 + $0x464] sm:$0xf]  ;;  %v3461_v48 = vld [vmem:[%s3996_s8 + $0x1f4] sm:$0xf0] }
  0x8f   : > { %1958 = vmatmul.bf16.vlgmr.msra.gmra.mxu3 %v4094_v6  ;;  %1964 = vmatpush.bf16.msrb.mxu0 %v2981_v24  ;;  %v2930_v56 = vld [vmem:[%s3996_s8 + $0x470] sm:$0xf0]  ;;  %v3570_v57 = vld [vmem:[%s3996_s8 + $0x564] sm:$0xf]  ;;  %v3333_v58 = vor.u32 %v3638_v50, %v3330_v51  ;;  %v2744_v49 = vld [vmem:[%s3996_s8 + $0x2e8] sm:$0xf] }
  0x90   : > { %v3058_v59 = vld [vmem:[%s3996_s8 + $0x570] sm:$0xf0]  ;;  %v3602_v60 = vld [vmem:[%s3996_s8 + $0x664] sm:$0xf]  ;;  %v2933_v0 = vor.u32 %v3538_v55, %v2930_v56  ;;  %v3493_v50 = vld [vmem:[%s3996_s8 + $0x2f4] sm:$0xf0]  ;;  %v2489_v56 = vor.u32 %v3429_v45, %v2488_v43 }
  0x91   : > { %1977 = vmatpush.bf16.msrb.mxu1 %v3109_v25  ;;  %1990 = vmatpush.bf16.msrb.mxu2 %v3237_v26  ;;  %v3186_v61 = vld [vmem:[%s3996_s8 + $0x670] sm:$0xf0]  ;;  %v3634_v62 = vld [vmem:[%s3996_s8 + $0x764] sm:$0xf]  ;;  %v3061_v1 = vor.u32 %v3570_v57, %v3058_v59  ;;  %v2472_v59 = vld [vmem:[%s3996_s8 + $0xc8] sm:$0xf] }
  0x92   : > { %2003 = vmatpush.bf16.msrb.mxu3 %v3365_v30  ;;  %v3314_v63 = vld [vmem:[%s3996_s8 + $0x770] sm:$0xf0]  ;;  %v3189_v2 = vor.u32 %v3602_v60, %v3186_v61  ;;  %v3534_v3 = vld [vmem:[%s3996_s8 + $0x444] sm:$0xf]  ;;  %v3425_v60 = vld [vmem:[%s3996_s8 + $0xd4] sm:$0xf0] }
  0x93   : > { %1965 = vmatpush.bf16.msrb.mxu0 %v2965_v36  ;;  %v2914_v5 = vld [vmem:[%s3996_s8 + $0x450] sm:$0xf0]  ;;  %v3566_v7 = vld [vmem:[%s3996_s8 + $0x544] sm:$0xf]  ;;  %v3317_v8 = vor.u32 %v3634_v62, %v3314_v63  ;;  %v2600_v61 = vld [vmem:[%s3996_s8 + $0x1c8] sm:$0xf] }
  0x94   : > { %v3042_v9 = vld [vmem:[%s3996_s8 + $0x550] sm:$0xf0]  ;;  %v3598_v10 = vld [vmem:[%s3996_s8 + $0x644] sm:$0xf]  ;;  %v2917_v14 = vor.u32 %v3534_v3, %v2914_v5  ;;  %v3457_v63 = vld [vmem:[%s3996_s8 + $0x1d4] sm:$0xf0]  ;;  %v2473_v5 = vor.u32 %v3425_v60, %v2472_v59 }
  0x95   : > { %1978 = vmatpush.bf16.msrb.mxu1 %v3093_v37  ;;  %1991 = vmatpush.bf16.msrb.mxu2 %v3221_v39  ;;  %v3170_v11 = vld [vmem:[%s3996_s8 + $0x650] sm:$0xf0]  ;;  %v3630_v12 = vld [vmem:[%s3996_s8 + $0x744] sm:$0xf]  ;;  %v3045_v15 = vor.u32 %v3566_v7, %v3042_v9  ;;  %v3521_v3 = vld [vmem:[%s3996_s8 + $0x3d4] sm:$0xf0]  ;;  %v2601_v7 = vor.u32 %v3457_v63, %v2600_v61 }
  0x96   : > { %2004 = vmatpush.bf16.msrb.mxu3 %v3349_v46  ;;  %v3298_v13 = vld [vmem:[%s3996_s8 + $0x750] sm:$0xf0]  ;;  %v3173_v16 = vor.u32 %v3598_v10, %v3170_v11  ;;  %v3530_v17 = vld [vmem:[%s3996_s8 + $0x424] sm:$0xf]  ;;  %v2616_v46 = vld [vmem:[%s3996_s8 + $0x1e8] sm:$0xf] }
  0x97   : > { %1966 = vmatpush.bf16.msrb.mxu0 %v2949_v52  ;;  %v2898_v18 = vld [vmem:[%s3996_s8 + $0x430] sm:$0xf0]  ;;  %v3562_v19 = vld [vmem:[%s3996_s8 + $0x524] sm:$0xf]  ;;  %v3301_v22 = vor.u32 %v3630_v12, %v3298_v13  ;;  %v2617_v57 = vor.u32 %v3461_v48, %v2616_v46  ;;  %v2456_v9 = vld [vmem:[%s3996_s8 + $0xa8] sm:$0xf] }
  0x98   : > { %v3026_v23 = vld [vmem:[%s3996_s8 + $0x530] sm:$0xf0]  ;;  %v3594_v24 = vld [vmem:[%s3996_s8 + $0x624] sm:$0xf]  ;;  %v2901_v28 = vor.u32 %v3530_v17, %v2898_v18  ;;  %v3421_v10 = vld [vmem:[%s3996_s8 + $0xb4] sm:$0xf0] }
  0x99   : > { %1979 = vmatpush.bf16.msrb.mxu1 %v3077_v53  ;;  %1992 = vmatpush.bf16.msrb.mxu2 %v3205_v54  ;;  %v3154_v25 = vld [vmem:[%s3996_s8 + $0x630] sm:$0xf0]  ;;  %v3626_v26 = vld [vmem:[%s3996_s8 + $0x724] sm:$0xf]  ;;  %v3029_v31 = vor.u32 %v3562_v19, %v3026_v23  ;;  %v2872_v53 = vld [vmem:[%s3996_s8 + $0x3e8] sm:$0xf]  ;;  %v2457_v18 = vor.u32 %v3421_v10, %v2456_v9 }
  0x9a   : > { %2005 = vmatpush.bf16.msrb.mxu3 %v3333_v58  ;;  %v3282_v27 = vld [vmem:[%s3996_s8 + $0x730] sm:$0xf0]  ;;  %v3526_v29 = vld [vmem:[%s3996_s8 + $0x404] sm:$0xf]  ;;  %v3157_v32 = vor.u32 %v3594_v24, %v3154_v25  ;;  %v3525_v54 = vld [vmem:[%s3996_s8 + $0x3f4] sm:$0xf0]  ;;  %v2745_v58 = vor.u32 %v3493_v50, %v2744_v49 }
  0x9b   : > { %1967 = vmatpush.bf16.msrb.mxu0 %v2933_v0  ;;  %v2882_v30 = vld [vmem:[%s3996_s8 + $0x410] sm:$0xf0]  ;;  %v3558_v33 = vld [vmem:[%s3996_s8 + $0x504] sm:$0xf]  ;;  %v3285_v36 = vor.u32 %v3626_v26, %v3282_v27  ;;  %v2873_v62 = vor.u32 %v3525_v54, %v2872_v53  ;;  %v2728_v0 = vld [vmem:[%s3996_s8 + $0x2c8] sm:$0xf] }
  0x9c   : > { %v3010_v34 = vld [vmem:[%s3996_s8 + $0x510] sm:$0xf0]  ;;  %v3590_v35 = vld [vmem:[%s3996_s8 + $0x604] sm:$0xf]  ;;  %v2885_v47 = vor.u32 %v3526_v29, %v2882_v30  ;;  %v2584_v11 = vld [vmem:[%s3996_s8 + $0x1a8] sm:$0xf] }
  0x9d   : > { %1980 = vmatpush.bf16.msrb.mxu1 %v3061_v1  ;;  %1993 = vmatpush.bf16.msrb.mxu2 %v3189_v2  ;;  %v3138_v37 = vld [vmem:[%s3996_s8 + $0x610] sm:$0xf0]  ;;  %v3622_v39 = vld [vmem:[%s3996_s8 + $0x704] sm:$0xf]  ;;  %v3013_v51 = vor.u32 %v3558_v33, %v3010_v34  ;;  %v3489_v1 = vld [vmem:[%s3996_s8 + $0x2d4] sm:$0xf0] }
  0x9e   : > { %2006 = vmatpush.bf16.msrb.mxu3 %v3317_v8  ;;  %v3266_v40 = vld [vmem:[%s3996_s8 + $0x710] sm:$0xf0]  ;;  %v3141_v52 = vor.u32 %v3590_v35, %v3138_v37  ;;  %v2856_v2 = vld [vmem:[%s3996_s8 + $0x3c8] sm:$0xf]  ;;  %v2729_v8 = vor.u32 %v3489_v1, %v2728_v0  ;;  %v3453_v13 = vld [vmem:[%s3996_s8 + $0x1b4] sm:$0xf0] }
  0x9f   : > { %1968 = vmatpush.bf16.msrb.mxu0 %v2917_v14  ;;  %v3269_v55 = vor.u32 %v3622_v39, %v3266_v40  ;;  %v2857_v12 = vor.u32 %v3521_v3, %v2856_v2  ;;  %v2712_v14 = vld [vmem:[%s3996_s8 + $0x2a8] sm:$0xf]  ;;  %v3517_v17 = vld [vmem:[%s3996_s8 + $0x3b4] sm:$0xf0]  ;;  %v2585_v19 = vor.u32 %v3453_v13, %v2584_v11 }
  0xa0   : > { %v2440_v23 = vld [vmem:[%s3996_s8 + $0x88] sm:$0xf]  ;;  %v3417_v24 = vld [vmem:[%s3996_s8 + $0x94] sm:$0xf0] }
  0xa1   : > { %1981 = vmatpush.bf16.msrb.mxu1 %v3045_v15  ;;  %1994 = vmatpush.bf16.msrb.mxu2 %v3173_v16  ;;  %v3485_v15 = vld [vmem:[%s3996_s8 + $0x2b4] sm:$0xf0]  ;;  %v2840_v16 = vld [vmem:[%s3996_s8 + $0x3a8] sm:$0xf] }
  0xa2   : > { %2007 = vmatpush.bf16.msrb.mxu3 %v3301_v22  ;;  %v2713_v22 = vor.u32 %v3485_v15, %v2712_v14  ;;  %v2568_v25 = vld [vmem:[%s3996_s8 + $0x188] sm:$0xf]  ;;  %v2841_v26 = vor.u32 %v3517_v17, %v2840_v16  ;;  %v3449_v27 = vld [vmem:[%s3996_s8 + $0x194] sm:$0xf0] }
  0xa3   : > { %1969 = vmatpush.bf16.msrb.mxu0 %v2901_v28  ;;  %v2696_v28 = vld [vmem:[%s3996_s8 + $0x288] sm:$0xf]  ;;  %v3481_v29 = vld [vmem:[%s3996_s8 + $0x294] sm:$0xf0]  ;;  %v2569_v33 = vor.u32 %v3449_v27, %v2568_v25 }
  0xa4   : > { %v2824_v30 = vld [vmem:[%s3996_s8 + $0x388] sm:$0xf]  ;;  %v2697_v34 = vor.u32 %v3481_v29, %v2696_v28  ;;  %v3445_v40 = vld [vmem:[%s3996_s8 + $0x174] sm:$0xf0] }
  0xa5   : > { %1982 = vmatpush.bf16.msrb.mxu1 %v3029_v31  ;;  %1995 = vmatpush.bf16.msrb.mxu2 %v3157_v32  ;;  %v3513_v31 = vld [vmem:[%s3996_s8 + $0x394] sm:$0xf0]  ;;  %v2441_v32 = vor.u32 %v3417_v24, %v2440_v23  ;;  %v2424_v35 = vld [vmem:[%s3996_s8 + $0x68] sm:$0xf] }
  0xa6   : > { %2008 = vmatpush.bf16.msrb.mxu3 %v3285_v36  ;;  %v3413_v36 = vld [vmem:[%s3996_s8 + $0x74] sm:$0xf0]  ;;  %v2552_v37 = vld [vmem:[%s3996_s8 + $0x168] sm:$0xf]  ;;  %v2825_v39 = vor.u32 %v3513_v31, %v2824_v30 }
  0xa7   : > { %1970 = vmatpush.bf16.msrb.mxu0 %v2885_v47  ;;  %v2680_v43 = vld [vmem:[%s3996_s8 + $0x268] sm:$0xf]  ;;  %v3477_v45 = vld [vmem:[%s3996_s8 + $0x274] sm:$0xf0]  ;;  %v2425_v48 = vor.u32 %v3413_v36, %v2424_v35  ;;  %v2553_v49 = vor.u32 %v3445_v40, %v2552_v37 }
  0xa8   : > { %v2808_v46 = vld [vmem:[%s3996_s8 + $0x368] sm:$0xf]  ;;  %v3509_v47 = vld [vmem:[%s3996_s8 + $0x374] sm:$0xf0]  ;;  %v2681_v50 = vor.u32 %v3477_v45, %v2680_v43 }
  0xa9   : > { %1983 = vmatpush.bf16.msrb.mxu1 %v3013_v51  ;;  %1996 = vmatpush.bf16.msrb.mxu2 %v3141_v52  ;;  %v2408_v51 = vld [vmem:[%s3996_s8 + $0x48] sm:$0xf]  ;;  %v3409_v52 = vld [vmem:[%s3996_s8 + $0x54] sm:$0xf0]  ;;  %v2809_v54 = vor.u32 %v3509_v47, %v2808_v46 }
  0xaa   : > { %2009 = vmatpush.bf16.msrb.mxu3 %v3269_v55  ;;  %1971 = vmatmul.bf16.vlgmr.msrb.gmra.mxu0 %v4164_v41  ;;  %v2536_v53 = vld [vmem:[%s3996_s8 + $0x148] sm:$0xf]  ;;  %v3441_v55 = vld [vmem:[%s3996_s8 + $0x154] sm:$0xf0]  ;;  %v2409_v60 = vor.u32 %v3409_v52, %v2408_v51 }
  0xab   : > { %2015 = vmatpush.bf16.msra.mxu0 %v2489_v56  ;;  %v2664_v56 = vld [vmem:[%s3996_s8 + $0x248] sm:$0xf]  ;;  %v3505_v59 = vld [vmem:[%s3996_s8 + $0x354] sm:$0xf0]  ;;  %v2537_v61 = vor.u32 %v3441_v55, %v2536_v53 }
  0xac   : > { %1997 = vmatmul.bf16.vlgmr.msrb.gmra.mxu2 %v4160_v38  ;;  %1984 = vmatmul.bf16.vlgmr.msrb.gmra.mxu1 %v4168_v44  ;;  %v2392_v63 = vld [vmem:[%s3996_s8 + $0x28] sm:$0xf]  ;;  %v3405_v0 = vld [vmem:[%s3996_s8 + $0x34] sm:$0xf0] }
  0xad   : > { %2028 = vmatpush.bf16.msra.mxu1 %v2617_v57  ;;  %2041 = vmatpush.bf16.msra.mxu2 %v2745_v58  ;;  %v3473_v57 = vld [vmem:[%s3996_s8 + $0x254] sm:$0xf0]  ;;  %v2792_v58 = vld [vmem:[%s3996_s8 + $0x348] sm:$0xf]  ;;  %v2393_v10 = vor.u32 %v3405_v0, %v2392_v63 }
  0xae   : > { %2054 = vmatpush.bf16.msra.mxu3 %v2873_v62  ;;  %v2665_v62 = vor.u32 %v3473_v57, %v2664_v56  ;;  %v2520_v1 = vld [vmem:[%s3996_s8 + $0x128] sm:$0xf]  ;;  %v2793_v2 = vor.u32 %v3505_v59, %v2792_v58  ;;  %v3437_v3 = vld [vmem:[%s3996_s8 + $0x134] sm:$0xf0] }
  0xaf   : > { %2010 = vmatmul.bf16.vlgmr.msrb.gmra.mxu3 %v4166_v42  ;;  %2016 = vmatpush.bf16.msra.mxu0 %v2473_v5  ;;  %v2648_v5 = vld [vmem:[%s3996_s8 + $0x228] sm:$0xf]  ;;  %v3501_v9 = vld [vmem:[%s3996_s8 + $0x334] sm:$0xf0]  ;;  %v2521_v13 = vor.u32 %v3437_v3, %v2520_v1 }
  0xb0   : > { %v2376_v11 = vld [vmem:[%s3996_s8 + $0x8] sm:$0xf]  ;;  %v3433_v16 = vld [vmem:[%s3996_s8 + $0x114] sm:$0xf0] }
  0xb1   : > { %2029 = vmatpush.bf16.msra.mxu1 %v2601_v7  ;;  %2042 = vmatpush.bf16.msra.mxu2 %v2729_v8  ;;  %v3469_v7 = vld [vmem:[%s3996_s8 + $0x234] sm:$0xf0]  ;;  %v2776_v8 = vld [vmem:[%s3996_s8 + $0x328] sm:$0xf] }
  0xb2   : > { %2055 = vmatpush.bf16.msra.mxu3 %v2857_v12  ;;  %v3401_v12 = vld [vmem:[%s3996_s8 + $0x14] sm:$0xf0]  ;;  %v2649_v14 = vor.u32 %v3469_v7, %v2648_v5  ;;  %v2504_v15 = vld [vmem:[%s3996_s8 + $0x108] sm:$0xf] }
  0xb3   : > { %2017 = vmatpush.bf16.msra.mxu0 %v2457_v18  ;;  %v2632_v17 = vld [vmem:[%s3996_s8 + $0x208] sm:$0xf]  ;;  %v2777_v18 = vor.u32 %v3501_v9, %v2776_v8  ;;  %v3497_v23 = vld [vmem:[%s3996_s8 + $0x314] sm:$0xf0]  ;;  %v2377_v27 = vor.u32 %v3401_v12, %v2376_v11  ;;  %v2505_v31 = vor.u32 %v3433_v16, %v2504_v15 }
  0xb4   : > { %v3000_v24 = vld [vmem:[%s3996_s8 + $0x4e8] sm:$0xf]  ;;  %v3557_v25 = vld [vmem:[%s3996_s8 + $0x4f4] sm:$0xf0] }
  0xb5   : > { %2030 = vmatpush.bf16.msra.mxu1 %v2585_v19  ;;  %2043 = vmatpush.bf16.msra.mxu2 %v2713_v22  ;;  %v3465_v19 = vld [vmem:[%s3996_s8 + $0x214] sm:$0xf0]  ;;  %v2760_v22 = vld [vmem:[%s3996_s8 + $0x308] sm:$0xf]  ;;  %v3001_v36 = vor.u32 %v3557_v25, %v3000_v24 }
  0xb6   : > { %2056 = vmatpush.bf16.msra.mxu3 %v2841_v26  ;;  %v3128_v26 = vld [vmem:[%s3996_s8 + $0x5e8] sm:$0xf]  ;;  %v3589_v28 = vld [vmem:[%s3996_s8 + $0x5f4] sm:$0xf0]  ;;  %v2761_v35 = vor.u32 %v3497_v23, %v2760_v22 }
  0xb7   : > { %2018 = vmatpush.bf16.msra.mxu0 %v2441_v32  ;;  %v3256_v29 = vld [vmem:[%s3996_s8 + $0x6e8] sm:$0xf]  ;;  %v3621_v30 = vld [vmem:[%s3996_s8 + $0x6f4] sm:$0xf0]  ;;  %v2633_v32 = vor.u32 %v3465_v19, %v2632_v17  ;;  %v3129_v37 = vor.u32 %v3589_v28, %v3128_v26 }
  0xb8   : > { %v2984_v40 = vld [vmem:[%s3996_s8 + $0x4c8] sm:$0xf]  ;;  %v3553_v43 = vld [vmem:[%s3996_s8 + $0x4d4] sm:$0xf0] }
  0xb9   : > { %2031 = vmatpush.bf16.msra.mxu1 %v2569_v33  ;;  %2044 = vmatpush.bf16.msra.mxu2 %v2697_v34  ;;  %v3384_v33 = vld [vmem:[%s3996_s8 + $0x7e8] sm:$0xf]  ;;  %v3653_v34 = vld [vmem:[%s3996_s8 + $0x7f4] sm:$0xf0]  ;;  %v2985_v52 = vor.u32 %v3553_v43, %v2984_v40 }
  0xba   : > { %2057 = vmatpush.bf16.msra.mxu3 %v2825_v39  ;;  %v3257_v39 = vor.u32 %v3621_v30, %v3256_v29  ;;  %v3112_v45 = vld [vmem:[%s3996_s8 + $0x5c8] sm:$0xf]  ;;  %v3385_v46 = vor.u32 %v3653_v34, %v3384_v33  ;;  %v3585_v47 = vld [vmem:[%s3996_s8 + $0x5d4] sm:$0xf0] }
  0xbb   : > { %2019 = vmatpush.bf16.msra.mxu0 %v2425_v48  ;;  %v3240_v48 = vld [vmem:[%s3996_s8 + $0x6c8] sm:$0xf]  ;;  %v3649_v51 = vld [vmem:[%s3996_s8 + $0x7d4] sm:$0xf0]  ;;  %v3113_v53 = vor.u32 %v3585_v47, %v3112_v45 }
  0xbc   : > { %v2968_v55 = vld [vmem:[%s3996_s8 + $0x4a8] sm:$0xf]  ;;  %v3549_v56 = vld [vmem:[%s3996_s8 + $0x4b4] sm:$0xf0] }
  0xbd   : > { %2032 = vmatpush.bf16.msra.mxu1 %v2553_v49  ;;  %2045 = vmatpush.bf16.msra.mxu2 %v2681_v50  ;;  %v3617_v49 = vld [vmem:[%s3996_s8 + $0x6d4] sm:$0xf0]  ;;  %v3368_v50 = vld [vmem:[%s3996_s8 + $0x7c8] sm:$0xf]  ;;  %v2969_v0 = vor.u32 %v3549_v56, %v2968_v55 }
  0xbe   : > { %2058 = vmatpush.bf16.msra.mxu3 %v2809_v54  ;;  %v3241_v54 = vor.u32 %v3617_v49, %v3240_v48  ;;  %v3096_v57 = vld [vmem:[%s3996_s8 + $0x5a8] sm:$0xf]  ;;  %v3369_v58 = vor.u32 %v3649_v51, %v3368_v50  ;;  %v3581_v59 = vld [vmem:[%s3996_s8 + $0x5b4] sm:$0xf0] }
  0xbf   : > { %2020 = vmatpush.bf16.msra.mxu0 %v2409_v60  ;;  %v3224_v60 = vld [vmem:[%s3996_s8 + $0x6a8] sm:$0xf]  ;;  %v3645_v63 = vld [vmem:[%s3996_s8 + $0x7b4] sm:$0xf0]  ;;  %v3097_v1 = vor.u32 %v3581_v59, %v3096_v57 }
  0xc0   : > { %v2952_v3 = vld [vmem:[%s3996_s8 + $0x488] sm:$0xf]  ;;  %v3545_v5 = vld [vmem:[%s3996_s8 + $0x494] sm:$0xf0] }
  0xc1   : > { %2033 = vmatpush.bf16.msra.mxu1 %v2537_v61  ;;  %2046 = vmatpush.bf16.msra.mxu2 %v2665_v62  ;;  %v3613_v61 = vld [vmem:[%s3996_s8 + $0x6b4] sm:$0xf0]  ;;  %v3352_v62 = vld [vmem:[%s3996_s8 + $0x7a8] sm:$0xf] }
  0xc2   : > { %2059 = vmatpush.bf16.msra.mxu3 %v2793_v2  ;;  %v3225_v2 = vor.u32 %v3613_v61, %v3224_v60  ;;  %v3080_v7 = vld [vmem:[%s3996_s8 + $0x588] sm:$0xf]  ;;  %v3353_v8 = vor.u32 %v3645_v63, %v3352_v62  ;;  %v3577_v9 = vld [vmem:[%s3996_s8 + $0x594] sm:$0xf0] }
  0xc3   : > { %2021 = vmatpush.bf16.msra.mxu0 %v2393_v10  ;;  %v3208_v10 = vld [vmem:[%s3996_s8 + $0x688] sm:$0xf]  ;;  %v3609_v11 = vld [vmem:[%s3996_s8 + $0x694] sm:$0xf0]  ;;  %v3081_v15 = vor.u32 %v3577_v9, %v3080_v7 }
  0xc4   : > { %v3336_v12 = vld [vmem:[%s3996_s8 + $0x788] sm:$0xf]  ;;  %v3209_v16 = vor.u32 %v3609_v11, %v3208_v10  ;;  %v3573_v23 = vld [vmem:[%s3996_s8 + $0x574] sm:$0xf0]  ;;  %v3427_v10 = vld [vmem:[%s3996_s8 + $0xec] sm:$0xf] }
  0xc5   : > { %2034 = vmatpush.bf16.msra.mxu1 %v2521_v13  ;;  %2047 = vmatpush.bf16.msra.mxu2 %v2649_v14  ;;  %v3641_v13 = vld [vmem:[%s3996_s8 + $0x794] sm:$0xf0]  ;;  %v2953_v14 = vor.u32 %v3545_v5, %v2952_v3  ;;  %v2936_v17 = vld [vmem:[%s3996_s8 + $0x468] sm:$0xf]  ;;  %v2490_v11 = vld [vmem:[%s3996_s8 + $0xf8] sm:$0xf0] }
  0xc6   : > { %2060 = vmatpush.bf16.msra.mxu3 %v2777_v18  ;;  %v3541_v18 = vld [vmem:[%s3996_s8 + $0x474] sm:$0xf0]  ;;  %v3064_v19 = vld [vmem:[%s3996_s8 + $0x568] sm:$0xf]  ;;  %v3337_v22 = vor.u32 %v3641_v13, %v3336_v12  ;;  %v3459_v12 = vld [vmem:[%s3996_s8 + $0x1ec] sm:$0xf] }
  0xc7   : > { %2022 = vmatpush.bf16.msra.mxu0 %v2377_v27  ;;  %v3192_v24 = vld [vmem:[%s3996_s8 + $0x668] sm:$0xf]  ;;  %v3605_v25 = vld [vmem:[%s3996_s8 + $0x674] sm:$0xf0]  ;;  %v2937_v28 = vor.u32 %v3541_v18, %v2936_v17  ;;  %v3065_v29 = vor.u32 %v3573_v23, %v3064_v19  ;;  %v2746_v17 = vld [vmem:[%s3996_s8 + $0x2f8] sm:$0xf0] }
  0xc8   : > { %v3320_v26 = vld [vmem:[%s3996_s8 + $0x768] sm:$0xf]  ;;  %v3637_v27 = vld [vmem:[%s3996_s8 + $0x774] sm:$0xf0]  ;;  %v3193_v30 = vor.u32 %v3605_v25, %v3192_v24  ;;  %v3523_v23 = vld [vmem:[%s3996_s8 + $0x3ec] sm:$0xf] }
  0xc9   : > { %2035 = vmatpush.bf16.msra.mxu1 %v2505_v31  ;;  %2048 = vmatpush.bf16.msra.mxu2 %v2633_v32  ;;  %v2920_v31 = vld [vmem:[%s3996_s8 + $0x448] sm:$0xf]  ;;  %v3537_v32 = vld [vmem:[%s3996_s8 + $0x454] sm:$0xf0]  ;;  %v3321_v34 = vor.u32 %v3637_v27, %v3320_v26  ;;  %v2874_v24 = vld [vmem:[%s3996_s8 + $0x3f8] sm:$0xf0]  ;;  %v2493_v27 = vor.u32 %v3427_v10, %v2490_v11 }
  0xca   : > { %2061 = vmatpush.bf16.msra.mxu3 %v2761_v35  ;;  %2023 = vmatmul.bf16.vlgmr.msra.gmra.mxu0 %v4105_v20  ;;  %v3048_v33 = vld [vmem:[%s3996_s8 + $0x548] sm:$0xf]  ;;  %v3569_v35 = vld [vmem:[%s3996_s8 + $0x554] sm:$0xf0]  ;;  %v2921_v45 = vor.u32 %v3537_v32, %v2920_v31  ;;  %v3423_v32 = vld [vmem:[%s3996_s8 + $0xcc] sm:$0xf] }
  0xcb   : > { %2067 = vmatpush.bf16.msrb.mxu0 %v3001_v36  ;;  %v3176_v36 = vld [vmem:[%s3996_s8 + $0x648] sm:$0xf]  ;;  %v3633_v40 = vld [vmem:[%s3996_s8 + $0x754] sm:$0xf0]  ;;  %v3049_v47 = vor.u32 %v3569_v35, %v3048_v33  ;;  %v2474_v33 = vld [vmem:[%s3996_s8 + $0xd8] sm:$0xf0]  ;;  %v2877_v35 = vor.u32 %v3523_v23, %v2874_v24 }
  0xcc   : > { %2049 = vmatmul.bf16.vlgmr.msra.gmra.mxu2 %v4091_v4  ;;  %2036 = vmatmul.bf16.vlgmr.msra.gmra.mxu1 %v4108_v21  ;;  %v2904_v49 = vld [vmem:[%s3996_s8 + $0x428] sm:$0xf]  ;;  %v3533_v50 = vld [vmem:[%s3996_s8 + $0x434] sm:$0xf0]  ;;  %v2682_v23 = vld [vmem:[%s3996_s8 + $0x278] sm:$0xf0] }
  0xcd   : > { %2080 = vmatpush.bf16.msrb.mxu1 %v3129_v37  ;;  %2093 = vmatpush.bf16.msrb.mxu2 %v3257_v39  ;;  %v3601_v37 = vld [vmem:[%s3996_s8 + $0x654] sm:$0xf0]  ;;  %v3304_v39 = vld [vmem:[%s3996_s8 + $0x748] sm:$0xf]  ;;  %v2905_v60 = vor.u32 %v3533_v50, %v2904_v49  ;;  %v3419_v49 = vld [vmem:[%s3996_s8 + $0xac] sm:$0xf] }
  0xce   : > { %2106 = vmatpush.bf16.msrb.mxu3 %v3385_v46  ;;  %v3177_v48 = vor.u32 %v3601_v37, %v3176_v36  ;;  %v3032_v51 = vld [vmem:[%s3996_s8 + $0x528] sm:$0xf]  ;;  %v3597_v56 = vld [vmem:[%s3996_s8 + $0x634] sm:$0xf0]  ;;  %v2602_v36 = vld [vmem:[%s3996_s8 + $0x1d8] sm:$0xf0] }
  0xcf   : > { %2062 = vmatmul.bf16.vlgmr.msra.gmra.mxu3 %v4094_v6  ;;  %2068 = vmatpush.bf16.msrb.mxu0 %v2985_v52  ;;  %v4413_v52 = vpop.f32.mrf.mxu2  ;;  %v3160_v55 = vld [vmem:[%s3996_s8 + $0x628] sm:$0xf]  ;;  %v4418_v57 = vpop.f32.mrf.mxu3  ;;  %v3629_v59 = vld [vmem:[%s3996_s8 + $0x734] sm:$0xf0]  ;;  %v3487_v37 = vld [vmem:[%s3996_s8 + $0x2cc] sm:$0xf] }
  0xd0   : > { %v2888_v61 = vld [vmem:[%s3996_s8 + $0x408] sm:$0xf]  ;;  %v3529_v62 = vld [vmem:[%s3996_s8 + $0x414] sm:$0xf0]  ;;  %v2458_v50 = vld [vmem:[%s3996_s8 + $0xb8] sm:$0xf0] }
  0xd1   : > { %2081 = vmatpush.bf16.msrb.mxu1 %v3113_v53  ;;  %2094 = vmatpush.bf16.msrb.mxu2 %v3241_v54  ;;  %v3305_v53 = vor.u32 %v3633_v40, %v3304_v39  ;;  %v3565_v54 = vld [vmem:[%s3996_s8 + $0x534] sm:$0xf0]  ;;  %v3144_v3 = vld [vmem:[%s3996_s8 + $0x608] sm:$0xf]  ;;  %v2730_v39 = vld [vmem:[%s3996_s8 + $0x2d8] sm:$0xf0] }
  0xd2   : > { %2107 = vmatpush.bf16.msrb.mxu3 %v3369_v58  ;;  %v3288_v58 = vld [vmem:[%s3996_s8 + $0x728] sm:$0xf]  ;;  %v3033_v63 = vor.u32 %v3565_v54, %v3032_v51  ;;  %v3593_v7 = vld [vmem:[%s3996_s8 + $0x614] sm:$0xf0]  ;;  %v3519_v40 = vld [vmem:[%s3996_s8 + $0x3cc] sm:$0xf] }
  0xd3   : > { %2069 = vmatpush.bf16.msrb.mxu0 %v2969_v0  ;;  %v3161_v0 = vor.u32 %v3597_v56, %v3160_v55  ;;  %v3289_v5 = vor.u32 %v3629_v59, %v3288_v58  ;;  %v3625_v9 = vld [vmem:[%s3996_s8 + $0x714] sm:$0xf0]  ;;  %v3451_v51 = vld [vmem:[%s3996_s8 + $0x1ac] sm:$0xf]  ;;  %v2586_v54 = vld [vmem:[%s3996_s8 + $0x1b8] sm:$0xf0]  ;;  %v2461_v59 = vor.u32 %v3419_v49, %v2458_v50 }
  0xd4   : > { %v3483_v55 = vld [vmem:[%s3996_s8 + $0x2ac] sm:$0xf]  ;;  %v2714_v56 = vld [vmem:[%s3996_s8 + $0x2b8] sm:$0xf0] }
  0xd5   : > { %2082 = vmatpush.bf16.msrb.mxu1 %v3097_v1  ;;  %2095 = vmatpush.bf16.msrb.mxu2 %v3225_v2  ;;  %v1816_v43 = vpop.f32.mrf.mxu0  ;;  %v1829_v46 = vpop.f32.mrf.mxu1  ;;  %v3016_v1 = vld [vmem:[%s3996_s8 + $0x508] sm:$0xf]  ;;  %v3561_v2 = vld [vmem:[%s3996_s8 + $0x514] sm:$0xf0]  ;;  %v3515_v58 = vld [vmem:[%s3996_s8 + $0x3ac] sm:$0xf] }
  0xd6   : > { %2108 = vmatpush.bf16.msrb.mxu3 %v3353_v8  ;;  %v3272_v8 = vld [vmem:[%s3996_s8 + $0x708] sm:$0xf]  ;;  %v3017_v19 = vor.u32 %v3561_v2, %v3016_v1  ;;  %v1830_v31 = vadd.f32 %v1829_v46, %v1816_v43  ;;  %v2477_v43 = vor.u32 %v3423_v32, %v2474_v33  ;;  %v3447_v1 = vld [vmem:[%s3996_s8 + $0x18c] sm:$0xf] }
  0xd7   : > { %2070 = vmatpush.bf16.msrb.mxu0 %v2953_v14  ;;  %v2889_v14 = vor.u32 %v3529_v62, %v2888_v61  ;;  %v1844_v25 = vpop.f32.mrf.mxu2  ;;  %v3273_v26 = vor.u32 %v3625_v9, %v3272_v8  ;;  %v2589_v61 = vor.u32 %v3451_v51, %v2586_v54  ;;  %v2717_v62 = vor.u32 %v3483_v55, %v2714_v56  ;;  %v3511_v8 = vld [vmem:[%s3996_s8 + $0x38c] sm:$0xf]  ;;  %v2826_v9 = vld [vmem:[%s3996_s8 + $0x398] sm:$0xf0] }
  0xd8   : > { %v3507_v24 = vld [vmem:[%s3996_s8 + $0x36c] sm:$0xf]  ;;  %v2810_v25 = vld [vmem:[%s3996_s8 + $0x378] sm:$0xf0] }
  0xd9   : > { %2083 = vmatpush.bf16.msrb.mxu1 %v3081_v15  ;;  %2096 = vmatpush.bf16.msrb.mxu2 %v3209_v16  ;;  %v2618_v15 = vld [vmem:[%s3996_s8 + $0x1f8] sm:$0xf0]  ;;  %v3491_v16 = vld [vmem:[%s3996_s8 + $0x2ec] sm:$0xf] }
  0xda   : > { %2109 = vmatpush.bf16.msrb.mxu3 %v3337_v22  ;;  %v3145_v22 = vor.u32 %v3593_v7, %v3144_v3  ;;  %v2570_v3 = vld [vmem:[%s3996_s8 + $0x198] sm:$0xf0]  ;;  %v3439_v32 = vld [vmem:[%s3996_s8 + $0x14c] sm:$0xf] }
  0xdb   : > { %2071 = vmatpush.bf16.msrb.mxu0 %v2937_v28  ;;  %v1857_v28 = vpop.f32.mrf.mxu3  ;;  %v2698_v7 = vld [vmem:[%s3996_s8 + $0x298] sm:$0xf0]  ;;  %v2573_v11 = vor.u32 %v3447_v1, %v2570_v3  ;;  %v3403_v51 = vld [vmem:[%s3996_s8 + $0x2c] sm:$0xf] }
  0xdc   : > { %v3435_v54 = vld [vmem:[%s3996_s8 + $0x12c] sm:$0xf] }
  0xdd   : > { %2084 = vmatpush.bf16.msrb.mxu1 %v3065_v29  ;;  %2097 = vmatpush.bf16.msrb.mxu2 %v3193_v30  ;;  %v1818_v13 = vpop.f32.mrf.mxu0  ;;  %v1831_v18 = vpop.f32.mrf.mxu1  ;;  %v2621_v29 = vor.u32 %v3459_v12, %v2618_v15  ;;  %v2749_v30 = vor.u32 %v3491_v16, %v2746_v17  ;;  %v3443_v15 = vld [vmem:[%s3996_s8 + $0x16c] sm:$0xf] }
  0xde   : > { %2110 = vmatpush.bf16.msrb.mxu3 %v3321_v34  ;;  %v3455_v34 = vld [vmem:[%s3996_s8 + $0x1cc] sm:$0xf]  ;;  %v2829_v18 = vor.u32 %v3511_v8, %v2826_v9 }
  0xdf   : > { %2072 = vmatpush.bf16.msrb.mxu0 %v2921_v45  ;;  %v2858_v45 = vld [vmem:[%s3996_s8 + $0x3d8] sm:$0xf0]  ;;  %v2605_v46 = vor.u32 %v3455_v34, %v2602_v36  ;;  %v3411_v13 = vld [vmem:[%s3996_s8 + $0x6c] sm:$0xf]  ;;  %v2813_v34 = vor.u32 %v3507_v24, %v2810_v25 }
  0xe0   : > { %v3471_v36 = vld [vmem:[%s3996_s8 + $0x24c] sm:$0xf]  ;;  %v3386_v25 = vld [vmem:[%s3996_s8 + $0x7f8] sm:$0xf0] }
  0xe1   : > { %2085 = vmatpush.bf16.msrb.mxu1 %v3049_v47  ;;  %2098 = vmatpush.bf16.msrb.mxu2 %v3177_v48  ;;  %v2733_v47 = vor.u32 %v3487_v37, %v2730_v39  ;;  %v1843_v48 = vadd.f32 %v4413_v52, %v1830_v31  ;;  %v2842_v52 = vld [vmem:[%s3996_s8 + $0x3b8] sm:$0xf0]  ;;  %v3431_v3 = vld [vmem:[%s3996_s8 + $0x10c] sm:$0xf] }
  0xe2   : > { %2111 = vmatpush.bf16.msrb.mxu3 %v3305_v53  ;;  %v2861_v53 = vor.u32 %v3519_v40, %v2858_v45  ;;  %v2845_v2 = vor.u32 %v3515_v58, %v2842_v52  ;;  %v2410_v31 = vld [vmem:[%s3996_s8 + $0x58] sm:$0xf0]  ;;  %v3503_v45 = vld [vmem:[%s3996_s8 + $0x34c] sm:$0xf] }
  0xe3   : > { %2073 = vmatpush.bf16.msrb.mxu0 %v2905_v60  ;;  %v1856_v60 = vadd.f32 %v4418_v57, %v1843_v48  ;;  %v2666_v37 = vld [vmem:[%s3996_s8 + $0x258] sm:$0xf0]  ;;  %v3467_v52 = vld [vmem:[%s3996_s8 + $0x22c] sm:$0xf] }
  0xe4   : > { %v2669_v50 = vor.u32 %v3471_v36, %v2666_v37  ;;  %v2522_v58 = vld [vmem:[%s3996_s8 + $0x138] sm:$0xf0]  ;;  %v3651_v24 = vld [vmem:[%s3996_s8 + $0x7ec] sm:$0xf] }
  0xe5   : > { %2086 = vmatpush.bf16.msrb.mxu1 %v3033_v63  ;;  %2099 = vmatpush.bf16.msrb.mxu2 %v3161_v0  ;;  %v3415_v63 = vld [vmem:[%s3996_s8 + $0x8c] sm:$0xf]  ;;  %v2442_v0 = vld [vmem:[%s3996_s8 + $0x98] sm:$0xf0]  ;;  %v2525_v1 = vor.u32 %v3435_v54, %v2522_v58 }
  0xe6   : > { %2112 = vmatpush.bf16.msrb.mxu3 %v3289_v5  ;;  %v3479_v5 = vld [vmem:[%s3996_s8 + $0x28c] sm:$0xf]  ;;  %v2445_v57 = vor.u32 %v3415_v63, %v2442_v0  ;;  %v2378_v0 = vld [vmem:[%s3996_s8 + $0x18] sm:$0xf0] }
  0xe7   : > { %2074 = vmatpush.bf16.msrb.mxu0 %v2889_v14  ;;  %v2701_v12 = vor.u32 %v3479_v5, %v2698_v7  ;;  %v2426_v14 = vld [vmem:[%s3996_s8 + $0x78] sm:$0xf0]  ;;  %v3399_v63 = vld [vmem:[%s3996_s8 + $0xc] sm:$0xf] }
  0xe8   : > { %v2506_v5 = vld [vmem:[%s3996_s8 + $0x118] sm:$0xf0]  ;;  %v3463_v7 = vld [vmem:[%s3996_s8 + $0x20c] sm:$0xf] }
  0xe9   : > { %2087 = vmatpush.bf16.msrb.mxu1 %v3017_v19  ;;  %2100 = vmatpush.bf16.msrb.mxu2 %v3145_v22  ;;  %v1868_v10 = vpop.f32.mrf.mxu0  ;;  %v2554_v19 = vld [vmem:[%s3996_s8 + $0x178] sm:$0xf0]  ;;  %v3475_v22 = vld [vmem:[%s3996_s8 + $0x26c] sm:$0xf] }
  0xea   : > { %2113 = vmatpush.bf16.msrb.mxu3 %v3273_v26  ;;  %2075 = vmatmul.bf16.vlgmr.msrb.gmra.mxu0 %v4164_v41  ;;  %v1869_v16 = vadd.f32 %v1868_v10, %v1856_v60  ;;  %v2557_v28 = vor.u32 %v3443_v15, %v2554_v19  ;;  %v3499_v60 = vld [vmem:[%s3996_s8 + $0x32c] sm:$0xf]  ;;  %v3258_v19 = vld [vmem:[%s3996_s8 + $0x6f8] sm:$0xf0] }
  0xeb   : > { %2119 = vmatpush.bf16.msra.mxu0 %v2493_v27  ;;  %v1881_v17 = vpop.f32.mrf.mxu1  ;;  %v2429_v27 = vor.u32 %v3411_v13, %v2426_v14  ;;  %v3495_v10 = vld [vmem:[%s3996_s8 + $0x30c] sm:$0xf]  ;;  %v3002_v14 = vld [vmem:[%s3996_s8 + $0x4f8] sm:$0xf0] }
  0xec   : > { %2101 = vmatmul.bf16.vlgmr.msrb.gmra.mxu2 %v4160_v38  ;;  %2088 = vmatmul.bf16.vlgmr.msrb.gmra.mxu1 %v4168_v44  ;;  %v1882_v26 = vadd.f32 %v1881_v17, %v1869_v16  ;;  %v3555_v13 = vld [vmem:[%s3996_s8 + $0x4ec] sm:$0xf]  ;;  %v2381_v16 = vor.u32 %v3399_v63, %v2378_v0  ;;  %v3130_v17 = vld [vmem:[%s3996_s8 + $0x5f8] sm:$0xf0] }
  0xed   : > { %2132 = vmatpush.bf16.msra.mxu1 %v2621_v29  ;;  %2145 = vmatpush.bf16.msra.mxu2 %v2749_v30  ;;  %v2685_v29 = vor.u32 %v3475_v22, %v2682_v23  ;;  %v3407_v30 = vld [vmem:[%s3996_s8 + $0x4c] sm:$0xf]  ;;  %v2509_v22 = vor.u32 %v3431_v3, %v2506_v5  ;;  %v3242_v36 = vld [vmem:[%s3996_s8 + $0x6d8] sm:$0xf0] }
  0xee   : > { %2158 = vmatpush.bf16.msra.mxu3 %v2877_v35  ;;  %v2538_v35 = vld [vmem:[%s3996_s8 + $0x158] sm:$0xf0]  ;;  %v3587_v15 = vld [vmem:[%s3996_s8 + $0x5ec] sm:$0xf] }
  0xef   : > { %2114 = vmatmul.bf16.vlgmr.msrb.gmra.mxu3 %v4166_v42  ;;  %2120 = vmatpush.bf16.msra.mxu0 %v2477_v43  ;;  %v1894_v33 = vpop.f32.mrf.mxu2  ;;  %v2794_v43 = vld [vmem:[%s3996_s8 + $0x358] sm:$0xf0]  ;;  %v2541_v49 = vor.u32 %v3439_v32, %v2538_v35  ;;  %v3583_v32 = vld [vmem:[%s3996_s8 + $0x5cc] sm:$0xf] }
  0xf0   : > { %v1895_v39 = vadd.f32 %v1894_v33, %v1882_v26  ;;  %v2797_v56 = vor.u32 %v3503_v45, %v2794_v43  ;;  %v3389_v33 = vor.u32 %v3651_v24, %v3386_v25  ;;  %v3615_v35 = vld [vmem:[%s3996_s8 + $0x6cc] sm:$0xf]  ;;  %v3338_v0 = vld [vmem:[%s3996_s8 + $0x798] sm:$0xf0] }
  0xf1   : > { %2133 = vmatpush.bf16.msra.mxu1 %v2605_v46  ;;  %2146 = vmatpush.bf16.msra.mxu2 %v2733_v47  ;;  %v2413_v46 = vor.u32 %v3407_v30, %v2410_v31  ;;  %v1870_v48 = vpop.f32.mrf.mxu0  ;;  %v3551_v30 = vld [vmem:[%s3996_s8 + $0x4cc] sm:$0xf]  ;;  %v2986_v31 = vld [vmem:[%s3996_s8 + $0x4d8] sm:$0xf0]  ;;  %v3245_v43 = vor.u32 %v3615_v35, %v3242_v36 }
  0xf2   : > { %2159 = vmatpush.bf16.msra.mxu3 %v2861_v53  ;;  %v1907_v40 = vpop.f32.mrf.mxu3  ;;  %v2394_v53 = vld [vmem:[%s3996_s8 + $0x38] sm:$0xf0]  ;;  %v3647_v37 = vld [vmem:[%s3996_s8 + $0x7cc] sm:$0xf] }
  0xf3   : > { %2121 = vmatpush.bf16.msra.mxu0 %v2461_v59  ;;  %v1908_v47 = vadd.f32 %v1907_v40, %v1895_v39  ;;  %v1883_v55 = vpop.f32.mrf.mxu1  ;;  %v2650_v59 = vld [vmem:[%s3996_s8 + $0x238] sm:$0xf0]  ;;  %v2989_v40 = vor.u32 %v3551_v30, %v2986_v31  ;;  %v3579_v48 = vld [vmem:[%s3996_s8 + $0x5ac] sm:$0xf] }
  0xf4   : > { %v3370_v39 = vld [vmem:[%s3996_s8 + $0x7d8] sm:$0xf0]  ;;  %v3643_v54 = vld [vmem:[%s3996_s8 + $0x7ac] sm:$0xf] }
  0xf5   : > { %2134 = vmatpush.bf16.msra.mxu1 %v2589_v61  ;;  %2147 = vmatpush.bf16.msra.mxu2 %v2717_v62  ;;  %v2778_v61 = vld [vmem:[%s3996_s8 + $0x338] sm:$0xf0]  ;;  %2227 = vst [vmem:[%s4494_s21] sm:$0xff] %v1908_v47  ;;  %v2397_v62 = vor.u32 %v3403_v51, %v2394_v53  ;;  %v3611_v51 = vld [vmem:[%s3996_s8 + $0x6ac] sm:$0xf] }
  0xf6   : > { %2160 = vmatpush.bf16.msra.mxu3 %v2845_v2  ;;  %v2653_v2 = vor.u32 %v3467_v52, %v2650_v59  ;;  %v2781_v9 = vor.u32 %v3499_v60, %v2778_v61  ;;  %v2970_v47 = vld [vmem:[%s3996_s8 + $0x4b8] sm:$0xf0]  ;;  %v3543_v52 = vld [vmem:[%s3996_s8 + $0x48c] sm:$0xf] }
  0xf7   : > { %2122 = vmatpush.bf16.msra.mxu0 %v2445_v57  ;;  %v1896_v8 = vpop.f32.mrf.mxu2  ;;  %v2634_v57 = vld [vmem:[%s3996_s8 + $0x218] sm:$0xf0]  ;;  %v3639_v63 = vld [vmem:[%s3996_s8 + $0x78c] sm:$0xf] }
  0xf8   : > { %v2637_v23 = vor.u32 %v3463_v7, %v2634_v57  ;;  %v3226_v53 = vld [vmem:[%s3996_s8 + $0x6b8] sm:$0xf0]  ;;  %v3539_v5 = vld [vmem:[%s3996_s8 + $0x46c] sm:$0xf]  ;;  %v3341_v57 = vor.u32 %v3639_v63, %v3338_v0 }
  0xf9   : > { %2135 = vmatpush.bf16.msra.mxu1 %v2573_v11  ;;  %2148 = vmatpush.bf16.msra.mxu2 %v2701_v12  ;;  %v2762_v11 = vld [vmem:[%s3996_s8 + $0x318] sm:$0xf0]  ;;  %v3229_v58 = vor.u32 %v3611_v51, %v3226_v53  ;;  %v3571_v8 = vld [vmem:[%s3996_s8 + $0x56c] sm:$0xf] }
  0xfa   : > { %2161 = vmatpush.bf16.msra.mxu3 %v2829_v18  ;;  %v1909_v12 = vpop.f32.mrf.mxu3  ;;  %v3619_v18 = vld [vmem:[%s3996_s8 + $0x6ec] sm:$0xf]  ;;  %v2765_v26 = vor.u32 %v3495_v10, %v2762_v11  ;;  %v3354_v55 = vld [vmem:[%s3996_s8 + $0x7b8] sm:$0xf0] }
  0xfb   : > { %2123 = vmatpush.bf16.msra.mxu0 %v2429_v27  ;;  %v3005_v27 = vor.u32 %v3555_v13, %v3002_v14  ;;  %v2954_v59 = vld [vmem:[%s3996_s8 + $0x498] sm:$0xf0]  ;;  %v3357_v60 = vor.u32 %v3643_v54, %v3354_v55  ;;  %v3603_v11 = vld [vmem:[%s3996_s8 + $0x66c] sm:$0xf] }
  0xfc   : > { %v3082_v61 = vld [vmem:[%s3996_s8 + $0x598] sm:$0xf0]  ;;  %v3635_v13 = vld [vmem:[%s3996_s8 + $0x76c] sm:$0xf] }
  0xfd   : > { %2136 = vmatpush.bf16.msra.mxu1 %v2557_v28  ;;  %2149 = vmatpush.bf16.msra.mxu2 %v2685_v29  ;;  %v3133_v28 = vor.u32 %v3587_v15, %v3130_v17  ;;  %v3261_v29 = vor.u32 %v3619_v18, %v3258_v19  ;;  %v2938_v7 = vld [vmem:[%s3996_s8 + $0x478] sm:$0xf0]  ;;  %v3535_v18 = vld [vmem:[%s3996_s8 + $0x44c] sm:$0xf] }
  0xfe   : > { %2162 = vmatpush.bf16.msra.mxu3 %v2813_v34  ;;  %v3114_v34 = vld [vmem:[%s3996_s8 + $0x5d8] sm:$0xf0]  ;;  %v2941_v15 = vor.u32 %v3539_v5, %v2938_v7  ;;  %v3531_v35 = vld [vmem:[%s3996_s8 + $0x42c] sm:$0xf] }
  0xff   : > { %2124 = vmatpush.bf16.msra.mxu0 %v2413_v46  ;;  %v3117_v45 = vor.u32 %v3583_v32, %v3114_v34  ;;  %v3547_v46 = vld [vmem:[%s3996_s8 + $0x4ac] sm:$0xf]  ;;  %v3066_v10 = vld [vmem:[%s3996_s8 + $0x578] sm:$0xf0] }
 0x100   : > { %v3194_v12 = vld [vmem:[%s3996_s8 + $0x678] sm:$0xf0]  ;;  %v3527_v53 = vld [vmem:[%s3996_s8 + $0x40c] sm:$0xf] }
 0x101   : > { %2137 = vmatpush.bf16.msra.mxu1 %v2541_v49  ;;  %2150 = vmatpush.bf16.msra.mxu2 %v2669_v50  ;;  %v3373_v49 = vor.u32 %v3647_v37, %v3370_v39  ;;  %v3098_v50 = vld [vmem:[%s3996_s8 + $0x5b8] sm:$0xf0]  ;;  %v3197_v17 = vor.u32 %v3603_v11, %v3194_v12  ;;  %v3563_v37 = vld [vmem:[%s3996_s8 + $0x52c] sm:$0xf] }
 0x102   : > { %2163 = vmatpush.bf16.msra.mxu3 %v2797_v56  ;;  %v2973_v56 = vor.u32 %v3547_v46, %v2970_v47  ;;  %v3322_v14 = vld [vmem:[%s3996_s8 + $0x778] sm:$0xf0]  ;;  %v3627_v47 = vld [vmem:[%s3996_s8 + $0x72c] sm:$0xf] }
 0x103   : > { %2125 = vmatpush.bf16.msra.mxu0 %v2397_v62  ;;  %v3210_v62 = vld [vmem:[%s3996_s8 + $0x698] sm:$0xf0]  ;;  %v3325_v24 = vor.u32 %v3635_v13, %v3322_v14  ;;  %v3559_v55 = vld [vmem:[%s3996_s8 + $0x50c] sm:$0xf] }
 0x104   : > { %v2922_v19 = vld [vmem:[%s3996_s8 + $0x458] sm:$0xf0] }
 0x105   : > { %2138 = vmatpush.bf16.msra.mxu1 %v2525_v1  ;;  %2151 = vmatpush.bf16.msra.mxu2 %v2653_v2  ;;  %v3050_v25 = vld [vmem:[%s3996_s8 + $0x558] sm:$0xf0]  ;;  %v2925_v31 = vor.u32 %v3535_v18, %v2922_v19 }
 0x106   : > { %2164 = vmatpush.bf16.msra.mxu3 %v2781_v9  ;;  %v3306_v30 = vld [vmem:[%s3996_s8 + $0x758] sm:$0xf0] }
 0x107   : > { %2126 = vmatpush.bf16.msra.mxu0 %v2381_v16  ;;  %v4541_v1 = vpop.f32.mrf.mxu0  ;;  %v3069_v16 = vor.u32 %v3571_v8, %v3066_v10  ;;  %v2906_v36 = vld [vmem:[%s3996_s8 + $0x438] sm:$0xf0] }
 0x108   : > { %v3162_v46 = vld [vmem:[%s3996_s8 + $0x638] sm:$0xf0] }
 0x109   : > { %2139 = vmatpush.bf16.msra.mxu1 %v2509_v22  ;;  %2152 = vmatpush.bf16.msra.mxu2 %v2637_v23  ;;  %v4546_v9 = vpop.f32.mrf.mxu1  ;;  %v3567_v22 = vld [vmem:[%s3996_s8 + $0x54c] sm:$0xf]  ;;  %v2890_v54 = vld [vmem:[%s3996_s8 + $0x418] sm:$0xf0] }
 0x10a   : > { %2165 = vmatpush.bf16.msra.mxu3 %v2765_v26  ;;  %2127 = vmatmul.bf16.vlgmr.msra.gmra.mxu0 %v4105_v20  ;;  %v3607_v20 = vld [vmem:[%s3996_s8 + $0x68c] sm:$0xf] }
 0x10b   : > { %2171 = vmatpush.bf16.msrb.mxu0 %v3005_v27  ;;  %v3213_v3 = vor.u32 %v3607_v20, %v3210_v62  ;;  %v3599_v26 = vld [vmem:[%s3996_s8 + $0x64c] sm:$0xf]  ;;  %v3178_v27 = vld [vmem:[%s3996_s8 + $0x658] sm:$0xf0]  ;;  %v2893_v20 = vor.u32 %v3527_v53, %v2890_v54 }
 0x10c   : > { %2153 = vmatmul.bf16.vlgmr.msra.gmra.mxu2 %v4091_v4  ;;  %2140 = vmatmul.bf16.vlgmr.msra.gmra.mxu1 %v4108_v21  ;;  %v3101_v4 = vor.u32 %v3579_v48, %v3098_v50  ;;  %v2957_v21 = vor.u32 %v3543_v52, %v2954_v59  ;;  %v3181_v34 = vor.u32 %v3599_v26, %v3178_v27  ;;  %v3290_v48 = vld [vmem:[%s3996_s8 + $0x738] sm:$0xf0]  ;;  %v3591_v52 = vld [vmem:[%s3996_s8 + $0x60c] sm:$0xf] }
 0x10d   : > { %2184 = vmatpush.bf16.msrb.mxu1 %v3133_v28  ;;  %2197 = vmatpush.bf16.msrb.mxu2 %v3261_v29  ;;  %v3631_v29 = vld [vmem:[%s3996_s8 + $0x74c] sm:$0xf]  ;;  %v3146_v59 = vld [vmem:[%s3996_s8 + $0x618] sm:$0xf0] }
 0x10e   : > { %2210 = vmatpush.bf16.msrb.mxu3 %v3389_v33  ;;  %v3053_v33 = vor.u32 %v3567_v22, %v3050_v25  ;;  %v3149_v63 = vor.u32 %v3591_v52, %v3146_v59 }
 0x10f   : > { %2166 = vmatmul.bf16.vlgmr.msra.gmra.mxu3 %v4094_v6  ;;  %2172 = vmatpush.bf16.msrb.mxu0 %v2989_v40  ;;  %v3575_v6 = vld [vmem:[%s3996_s8 + $0x58c] sm:$0xf]  ;;  %v1946_v23 = vpop.f32.mrf.mxu2  ;;  %v1922_v32 = vpop.f32.mrf.mxu0  ;;  %v3309_v40 = vor.u32 %v3631_v29, %v3306_v30 }
 0x110   : > { %v3085_v2 = vor.u32 %v3575_v6, %v3082_v61  ;;  %v3274_v61 = vld [vmem:[%s3996_s8 + $0x718] sm:$0xf0] }
 0x111   : > { %2185 = vmatpush.bf16.msrb.mxu1 %v3117_v45  ;;  %2198 = vmatpush.bf16.msrb.mxu2 %v3245_v43  ;;  %v1935_v39 = vpop.f32.mrf.mxu1  ;;  %v3034_v45 = vld [vmem:[%s3996_s8 + $0x538] sm:$0xf0]  ;;  %v3595_v43 = vld [vmem:[%s3996_s8 + $0x62c] sm:$0xf] }
 0x112   : > { %2211 = vmatpush.bf16.msrb.mxu3 %v3373_v49  ;;  %v1959_v28 = vpop.f32.mrf.mxu3  ;;  %v2909_v49 = vor.u32 %v3531_v35, %v2906_v36  ;;  %v3037_v50 = vor.u32 %v3563_v37, %v3034_v45  ;;  %v3165_v51 = vor.u32 %v3595_v43, %v3162_v46 }
 0x113   : > { %2173 = vmatpush.bf16.msrb.mxu0 %v2973_v56 }
 0x115   : > { %2186 = vmatpush.bf16.msrb.mxu1 %v3101_v4  ;;  %2199 = vmatpush.bf16.msrb.mxu2 %v3229_v58  ;;  %v3293_v4 = vor.u32 %v3627_v47, %v3290_v48  ;;  %v3018_v58 = vld [vmem:[%s3996_s8 + $0x518] sm:$0xf0] }
 0x116   : > { %2212 = vmatpush.bf16.msrb.mxu3 %v3357_v60  ;;  %v3623_v60 = vld [vmem:[%s3996_s8 + $0x70c] sm:$0xf]  ;;  %v3021_v62 = vor.u32 %v3559_v55, %v3018_v58 }
 0x117   : > { %2174 = vmatpush.bf16.msrb.mxu0 %v2957_v21  ;;  %v1948_v56 = vpop.f32.mrf.mxu2  ;;  %v3277_v0 = vor.u32 %v3623_v60, %v3274_v61  ;;  %v1934_v21 = vadd.f32 %v4546_v9, %v4541_v1 }
 0x119   : > { %2187 = vmatpush.bf16.msrb.mxu1 %v3085_v2  ;;  %2200 = vmatpush.bf16.msrb.mxu2 %v3213_v3  ;;  %v1947_v2 = vadd.f32 %v1946_v23, %v1934_v21 }
 0x11a   : > { %2213 = vmatpush.bf16.msrb.mxu3 %v3341_v57  ;;  %v1961_v6 = vpop.f32.mrf.mxu3 }
 0x11b   : > { %2175 = vmatpush.bf16.msrb.mxu0 %v2941_v15  ;;  %v1960_v3 = vadd.f32 %v1959_v28, %v1947_v2 }
 0x11d   : > { %2188 = vmatpush.bf16.msrb.mxu1 %v3069_v16  ;;  %2201 = vmatpush.bf16.msrb.mxu2 %v3197_v17 }
 0x11e   : > { %2214 = vmatpush.bf16.msrb.mxu3 %v3325_v24 }
 0x11f   : > { %2176 = vmatpush.bf16.msrb.mxu0 %v2925_v31 }
 0x121   : > { %2189 = vmatpush.bf16.msrb.mxu1 %v3053_v33  ;;  %2202 = vmatpush.bf16.msrb.mxu2 %v3181_v34 }
 0x122   : > { %2215 = vmatpush.bf16.msrb.mxu3 %v3309_v40 }
 0x123   : > { %2177 = vmatpush.bf16.msrb.mxu0 %v2909_v49 }
 0x125   : > { %2190 = vmatpush.bf16.msrb.mxu1 %v3037_v50  ;;  %2203 = vmatpush.bf16.msrb.mxu2 %v3165_v51 }
 0x126   : > { %2216 = vmatpush.bf16.msrb.mxu3 %v3293_v4 }
 0x127   : > { %2178 = vmatpush.bf16.msrb.mxu0 %v2893_v20  ;;  %v1972_v5 = vpop.f32.mrf.mxu0 }
 0x128   : > { %v1973_v7 = vadd.f32 %v1972_v5, %v1960_v3 }
 0x129   : > { %2191 = vmatpush.bf16.msrb.mxu1 %v3021_v62  ;;  %2204 = vmatpush.bf16.msrb.mxu2 %v3149_v63  ;;  %v1985_v8 = vpop.f32.mrf.mxu1 }
 0x12a   : > { %2217 = vmatpush.bf16.msrb.mxu3 %v3277_v0  ;;  %2179 = vmatmul.bf16.vlgmr.msrb.gmra.mxu0 %v4164_v41  ;;  %v1986_v57 = vadd.f32 %v1985_v8, %v1973_v7 }
 0x12c   : > { %2192 = vmatmul.bf16.vlgmr.msrb.gmra.mxu1 %v4168_v44  ;;  %2205 = vmatmul.bf16.vlgmr.msrb.gmra.mxu2 %v4160_v38 }
 0x12d   : > { %2218 = vmatmul.bf16.vlgmr.msrb.gmra.mxu3 %v4166_v42 }
 0x12f   : > { %v1998_v1 = vpop.f32.mrf.mxu2  ;;  %v1974_v12 = vpop.f32.mrf.mxu0 }
 0x130   : > { %v1999_v9 = vadd.f32 %v1998_v1, %v1986_v57 }
 0x131   : > { %v1987_v13 = vpop.f32.mrf.mxu1 }
 0x132   : > { %v2011_v10 = vpop.f32.mrf.mxu3 }
 0x133   : > { %v2012_v11 = vadd.f32 %v2011_v10, %v1999_v9 }
 0x135   : > { %2228 = vst [vmem:[%s4494_s21 + $0x8] sm:$0xff] %v2012_v11 }
 0x137   : > { %v2000_v41 = vpop.f32.mrf.mxu2 }
 0x13a   : > { %v2013_v14 = vpop.f32.mrf.mxu3 }
 0x147   : > { %v2024_v15 = vpop.f32.mrf.mxu0 }
 0x149   : > { %v2037_v44 = vpop.f32.mrf.mxu1 }
 0x14a   : > { %v2038_v22 = vadd.f32 %v2037_v44, %v2024_v15 }
 0x14f   : > { %v2050_v16 = vpop.f32.mrf.mxu2  ;;  %v2026_v17 = vpop.f32.mrf.mxu0 }
 0x150   : > { %v2051_v23 = vadd.f32 %v2050_v16, %v2038_v22 }
 0x151   : > { %v2039_v42 = vpop.f32.mrf.mxu1 }
 0x152   : > { %v2063_v38 = vpop.f32.mrf.mxu3 }
 0x153   : > { %v2064_v24 = vadd.f32 %v2063_v38, %v2051_v23 }
 0x157   : > { %v2052_v18 = vpop.f32.mrf.mxu2 }
 0x15a   : > { %v2065_v19 = vpop.f32.mrf.mxu3 }
 0x167   : > { %v2076_v25 = vpop.f32.mrf.mxu0 }
 0x168   : > { %v2077_v26 = vadd.f32 %v2076_v25, %v2064_v24 }
 0x169   : > { %v2089_v27 = vpop.f32.mrf.mxu1 }
 0x16a   : > { %v2090_v28 = vadd.f32 %v2089_v27, %v2077_v26 }
 0x16f   : > { %v2102_v29 = vpop.f32.mrf.mxu2  ;;  %v2078_v33 = vpop.f32.mrf.mxu0 }
 0x170   : > { %v2103_v30 = vadd.f32 %v2102_v29, %v2090_v28 }
 0x171   : > { %v2091_v34 = vpop.f32.mrf.mxu1 }
 0x172   : > { %v2115_v31 = vpop.f32.mrf.mxu3 }
 0x173   : > { %v2116_v32 = vadd.f32 %v2115_v31, %v2103_v30 }
 0x175   : > { %2229 = vst [vmem:[%s4494_s21 + $0x10] sm:$0xff] %v2116_v32 }
 0x177   : > { %v2104_v35 = vpop.f32.mrf.mxu2 }
 0x17a   : > { %v2117_v36 = vpop.f32.mrf.mxu3 }
 0x187   : > { %v2128_v37 = vpop.f32.mrf.mxu0 }
 0x189   : > { %v2141_v39 = vpop.f32.mrf.mxu1 }
 0x18a   : > { %v2142_v49 = vadd.f32 %v2141_v39, %v2128_v37 }
 0x18f   : > { %v2154_v40 = vpop.f32.mrf.mxu2  ;;  %v2130_v43 = vpop.f32.mrf.mxu0 }
 0x190   : > { %v2155_v50 = vadd.f32 %v2154_v40, %v2142_v49 }
 0x191   : > { %v2143_v46 = vpop.f32.mrf.mxu1 }
 0x192   : > { %v2167_v45 = vpop.f32.mrf.mxu3 }
 0x193   : > { %v2168_v51 = vadd.f32 %v2167_v45, %v2155_v50 }
 0x197   : > { %v2156_v47 = vpop.f32.mrf.mxu2 }
 0x19a   : > { %v2169_v48 = vpop.f32.mrf.mxu3 }
 0x1a7   : > { %v2180_v53 = vpop.f32.mrf.mxu0 }
 0x1a8   : > { %v2181_v55 = vadd.f32 %v2180_v53, %v2168_v51 }
 0x1a9   : > { %v2193_v54 = vpop.f32.mrf.mxu1 }
 0x1aa   : > { %v2194_v56 = vadd.f32 %v2193_v54, %v2181_v55 }
 0x1af   : > { %v2206_v4 = vpop.f32.mrf.mxu2  ;;  %v2182_v59 = vpop.f32.mrf.mxu0 }
 0x1b0   : > { %v2207_v58 = vadd.f32 %v2206_v4, %v2194_v56  ;;  %v2219_v52 = vpop.f32.mrf.mxu3 }
 0x1b1   : > { %v2195_v6 = vpop.f32.mrf.mxu1 }
 0x1b2   : > { %v2220_v60 = vadd.f32 %v2219_v52, %v2207_v58 }
 0x1b4   : > { %2230 = vst [vmem:[%s4494_s21 + $0x18] sm:$0xff] %v2220_v60 }
 0x1b7   : > { %v2208_v61 = vpop.f32.mrf.mxu2 }
 0x1b8   : > { %3812 = shalt.err (!%p3809_p13)
}
 0x1b9   : > { %3659 = dma.vmem_to_hbm [thread:$0]  (%p3941_p9), %s2246_s26, 512, %s2248_s19, %s2232_s27   ;;  %v2221_v20 = vpop.f32.mrf.mxu3 }
 0x1ba PF: > { %s2259_s3 = sand.u32 1, %s3851_s9   ;;  %p3669_p0 = pnand %p2354_p12, %p3948_p11 }
 0x1bb   : > { %s2260_s25 = scalar_lea.sflag [#allocation4], %s2259_s3 }
 0x1bc   : > { %p3670_p1 = pneg %p3669_p0 }
 0x1be   : > { %3846 = dma.done.wait (%p3670_p1), %s2260_s25, 512  }
 0x1bf   : > { %3848 = vsyncadd (%p3670_p1), %s2260_s25, 4294966784  ;;  %s21_s14 = sadd.s32 1, %s3871_s14   ;;  %s4633_s9 = smov %s3855_s10 }
 0x1c0   : > { %p18_p2 = scmp.ge.s32.totalorder %s21_s14, 4   ;;  %s4634_s10 = smov %s3859_s11 }
 0x1c1   : > { %s4635_s11 = smov %s3946_s23  ;;  %s4636_s12 = smov %s3867_s13 }
 0x1c2   : > { %s4637_s13 = smov %s4639_s17  ;;  %20 = sbr.rel (!%p18_p2) target bundleno = 8 (0x8), region = 90 }
 0x1c7   :  { %2266 = vsyncpa [#allocation3], 1 }
 0x1c8   :  { %2268 = vsyncpa [#allocation3 + $0x1], 1 }
 0x1c9   :  { %2269 = vsyncpa [#allocation6], 1 }
 0x1ca   :  { %2271 = vsyncpa [#allocation6 + $0x1], 1 }
 0x1cb   :  { %2272 = vsyncpa [#allocation4], 1 }
 0x1cc   :  { %2274 = vsyncpa [#allocation4 + $0x1], 1 }

</bundles_post_ra>
